<compile_context>
chip_gen: v7x
topology: tpu7x:2x2x1
jax: 0.10.0
libtpu: 0.0.40
codegen_flags: <defaults>
</compile_context>

<pallas_src>
import jax
import jax.numpy as jnp
import numpy as np
from jax import lax
from jax.experimental import pallas as pl
from jax.experimental.pallas import tpu as pltpu


def _round_up(x, m):
    return ((x + m - 1) // m) * m


def _pick_bt(B, H, max_rows=256):
    """Largest divisor of B with Bt*H <= max_rows (fill the MXU M dimension).

    With large B this still leaves B//Bt >= 2 batch groups for v7x's two
    TensorCores; with small B we prefer filling M over megacore splitting.
    """
    best = 1
    for bt in range(1, B + 1):
        if B % bt == 0 and bt * H <= max_rows:
            best = bt
    return best


# ----------------------------------------------------------------------------
# Host/wrapper-side weight prep: fold the W-axis conv taps (and the horizontal
# 'same' padding) into a block-Toeplitz matrix so each conv's W/channel work is
# a single matmul contraction.
# ----------------------------------------------------------------------------
def _toeplitz(sub, W, Chid, HS, n_gates):
    """sub: (KH, KW, C, n_gates*Chid) HWIO slice -> (KH*W*C, n_gates*HS).

    Row layout (matches the lane-dense patch): row = kh*(W*C) + w_in*C + c.
    Col layout: col = g*HS + w_out*Chid + co (Nh..HS-1 zero-padded per gate).
    """
    KH, KW, C, NG = sub.shape
    assert NG == n_gates * Chid
    pw = KW // 2
    Nh = W * Chid
    w_in = jnp.arange(W)[:, None, None]
    kw = jnp.arange(KW)[None, :, None]
    w_out = jnp.arange(W)[None, None, :]
    # tap kw connects input col w_in to output col w_out iff kw = w_in - w_out + pw
    Tw = (w_in == w_out + kw - pw).astype(sub.dtype)                 # (W, KW, W)
    m = jnp.einsum('ikw,hkcn->hicwn', Tw, sub)                       # (KH,W,C,W,NG)
    m = m.reshape(KH, W * C, W, n_gates, Chid)
    m = jnp.transpose(m, (0, 1, 3, 2, 4))                            # (KH,W*C,nG,W,Chid)
    m = m.reshape(KH, W * C, n_gates, Nh)
    m = jnp.pad(m, ((0, 0), (0, 0), (0, 0), (0, HS - Nh)))
    return m.reshape(KH * W * C, n_gates * HS)


def _bias_big(bias, W, Chid, HS, n_gates):
    """bias (1, n_gates*Chid) -> (1, n_gates*HS) in the gate/lane layout."""
    Nh = W * Chid
    b = bias.reshape(n_gates, 1, Chid)
    b = jnp.broadcast_to(b, (n_gates, W, Chid)).reshape(n_gates, Nh)
    b = jnp.pad(b, ((0, 0), (0, HS - Nh)))
    return b.reshape(1, n_gates * HS).astype(jnp.float32)


def _build_x_patch(x_seq, KH):
    """KH row-shifted (zero halo) lane-dense copies of the layer input, bf16.

    x_seq: (T, B, H, W*Cin) -> (T, B, H, KH*W*Cin).  Built once per layer in
    the wrapper (does not depend on the recurrence), so the recurrent kernel
    never scatters or re-casts the input.
    """
    ph = KH // 2
    xb = x_seq.astype(jnp.bfloat16)
    T_, B_, H_, C_ = xb.shape
    parts = []
    for kh in range(KH):
        s = ph - kh                           # out[r] = x[r - s]  (zero outside)
        if s == 0:
            parts.append(xb)
        elif s > 0:
            pad = jnp.zeros((T_, B_, s, C_), xb.dtype)
            parts.append(jnp.concatenate([pad, xb[:, :, :H_ - s, :]], axis=2))
        else:
            pad = jnp.zeros((T_, B_, -s, C_), xb.dtype)
            parts.append(jnp.concatenate([xb[:, :, -s:, :], pad], axis=2))
    return jnp.concatenate(parts, axis=-1)


# ----------------------------------------------------------------------------
# Pallas kernel: one ConvGRU layer, grid = (batch_groups, time)
# ----------------------------------------------------------------------------
def _make_layer_kernel(Bt, H, Nh, HS, Kx, KH, ph, with_gates):
    BH = Bt * H

    def shifted_cols(a, row_in_img):
        # a: (BH, Nh) f32.  Returns (BH, KH*Nh) f32: KH vertically shifted
        # copies (zero halo rows).  pltpu.roll (XLU slot) + VPU mask + lane
        # concat at 128-aligned offsets — no stores, no misaligned vst.
        parts = []
        for kh in range(KH):
            s = ph - kh                       # out[r] = a[r - s]
            if s == 0:
                parts.append(a)
                continue
            rolled = pltpu.roll(a, s % BH, axis=0)
            if s > 0:
                valid = row_in_img >= s
            else:
                valid = row_in_img < (H + s)
            parts.append(jnp.where(valid, rolled, 0.0))
        return jnp.concatenate(parts, axis=-1)

    def body(xp_ref, wx_ref, whg_ref, whc_ref, bg_ref, bc_ref,
             hseq_ref, rseq_ref, useq_ref, h_state):
        t = pl.program_id(1)

        @pl.when(t == 0)
        def _():
            # ConvGRU._init_hidden: zero hidden state at the start of each
            # batch group (time is the innermost, "arbitrary" grid axis).
            h_state[...] = jnp.zeros_like(h_state)

        h = h_state[...]                                      # (BH, Nh) f32
        row_in_img = lax.broadcasted_iota(jnp.int32, (BH, Nh), 0) % H

        # x contribution to BOTH convs: one matmul on the pre-built bf16 patch.
        xp = xp_ref[0].reshape(BH, Kx)                        # bf16
        xpart = jnp.dot(xp, wx_ref[...], preferred_element_type=jnp.float32)

        # ---- conv_gates([x, h]) : h columns only (x part already in xpart) ---
        hcol = shifted_cols(h, row_in_img).astype(jnp.bfloat16)     # (BH, KH*Nh)
        g = (xpart[:, :2 * HS]
             + jnp.dot(hcol, whg_ref[...], preferred_element_type=jnp.float32)
             + bg_ref[...])
        reset = jax.nn.sigmoid(g[:, :Nh])                     # gamma gate
        update = jax.nn.sigmoid(g[:, HS:HS + Nh])             # beta  gate

        # ---- conv_can([x, reset*h]) : h columns only --------------------------
        rcol = shifted_cols(reset * h, row_in_img).astype(jnp.bfloat16)
        cc = (xpart[:, 2 * HS:]
              + jnp.dot(rcol, whc_ref[...], preferred_element_type=jnp.float32)
              + bc_ref[...])
        cnm = jnp.tanh(cc[:, :Nh])
        # TODO(synk): NONLocalBlock2D (nl=True) path not implemented; the class
        # was not provided and the module default is nl=False.

        h_next = (1.0 - update) * h + update * cnm
        h_state[...] = h_next
        hseq_ref[0] = h_next.reshape(Bt, H, Nh)
        if with_gates:
            rseq_ref[0] = reset.reshape(Bt, H, Nh)
            useq_ref[0] = update.reshape(Bt, H, Nh)

    if with_gates:
        def kernel(xp, wx, whg, whc, bg, bc, hseq, rseq, useq, hst):
            body(xp, wx, whg, whc, bg, bc, hseq, rseq, useq, hst)
    else:
        def kernel(xp, wx, whg, whc, bg, bc, hseq, hst):
            body(xp, wx, whg, whc, bg, bc, hseq, None, None, hst)
    return kernel


def convgru_layer(x_seq, wg, bg, wc, bc, Cin, Chid, *, with_gates=True):
    """One ConvGRU layer over a full sequence (lane-dense layout).

    x_seq : (T, B, H, W*Cin) f32
    wg    : (KH, KW, Cin+Chid, 2*Chid) HWIO    bg : (1, 2*Chid)
    wc    : (KH, KW, Cin+Chid, Chid)   HWIO    bc : (1, Chid)
    Returns a tuple of (T, B, H, W*Chid) f32 arrays: (h_seq[, reset_seq, update_seq]).
    """
    T, B, H, WCin = x_seq.shape
    assert WCin % Cin == 0
    W = WCin // Cin
    KH, KW = wg.shape[0], wg.shape[1]
    ph = KH // 2
    Nh = W * Chid
    HS = _round_up(Nh, 128)     # gate-output stride (128-aligned reset/update split)
    Kx = KH * WCin              # x contraction depth (no zero-padding)
    Kh = KH * Nh                # h contraction depth

    # Block-Toeplitz weights (W taps + horizontal 'same' padding folded in).
    wx = jnp.concatenate(
        [_toeplitz(wg[:, :, :Cin, :], W, Chid, HS, 2),
         _toeplitz(wc[:, :, :Cin, :], W, Chid, HS, 1)], axis=1).astype(jnp.bfloat16)
    wh_g = _toeplitz(wg[:, :, Cin:, :], W, Chid, HS, 2).astype(jnp.bfloat16)
    wh_c = _toeplitz(wc[:, :, Cin:, :], W, Chid, HS, 1).astype(jnp.bfloat16)
    bg_big = _bias_big(bg, W, Chid, HS, 2)
    bc_big = _bias_big(bc, W, Chid, HS, 1)

    # Hoisted, pre-cast x im2col (independent of the recurrence).
    x_patch = _build_x_patch(x_seq, KH)          # (T, B, H, Kx) bf16

    Bt = _pick_bt(B, H)                          # fill MXU M = Bt*H
    n_out = 3 if with_gates else 1
    kernel = _make_layer_kernel(Bt, H, Nh, HS, Kx, KH, ph, with_gates)

    out_shape = tuple(jax.ShapeDtypeStruct((T, B, H, Nh), jnp.float32)
                      for _ in range(n_out))
    out_spec = pl.BlockSpec((1, Bt, H, Nh), lambda b, t: (t, b, 0, 0))

    grid_spec = pltpu.PrefetchScalarGridSpec(
        num_scalar_prefetch=0,
        # Time MUST be the innermost grid axis and 'arbitrary': the hidden
        # state is carried in VMEM scratch across t and reset at t == 0.
        grid=(B // Bt, T),
        in_specs=[
            pl.BlockSpec((1, Bt, H, Kx), lambda b, t: (t, b, 0, 0)),
            # Constant (0,0) index maps -> fetched once across the grid.
            pl.BlockSpec((Kx, 3 * HS), lambda b, t: (0, 0)),
            pl.BlockSpec((Kh, 2 * HS), lambda b, t: (0, 0)),
            pl.BlockSpec((Kh, HS), lambda b, t: (0, 0)),
            pl.BlockSpec((1, 2 * HS), lambda b, t: (0, 0)),
            pl.BlockSpec((1, HS), lambda b, t: (0, 0)),
        ],
        out_specs=tuple(out_spec for _ in range(n_out)),
        scratch_shapes=[
            pltpu.VMEM((Bt * H, Nh), jnp.float32),   # carried hidden state (f32)
        ],
    )

    return pl.pallas_call(
        kernel,
        out_shape=out_shape,
        grid_spec=grid_spec,
        compiler_params=pltpu.CompilerParams(
            dimension_semantics=("parallel", "arbitrary")),
    )(x_patch, wx, wh_g, wh_c, bg_big, bc_big)


# ----------------------------------------------------------------------------
# ConvGRU (multi-layer) wrapper — mirrors ConvGRU.forward
# ----------------------------------------------------------------------------
def convgru_forward(params, input_tensor, batch_first=False, return_all_layers=True,
                    return_gates=True):
    """params: list of (wg, bg, wc, bc, hidden_dim) per layer (HWIO weights).

    Set return_gates=False when the reset/update sequences are not consumed to
    drop 2/3 of the per-step HBM writeback.
    """
    if not batch_first:
        input_tensor = jnp.transpose(input_tensor, (1, 0, 2, 3, 4))  # -> (b,t,c,h,w)
    b, t, c, h, w = input_tensor.shape
    # time-major, lane-dense: (t, b, h, w*c)
    cur = jnp.transpose(input_tensor, (1, 0, 3, 4, 2)).reshape(t, b, h, w * c)

    layer_output_list, layer_reset_list, layer_update_list, last_state_list = [], [], [], []
    cin = c
    for (wg, bg, wc, bc, hid) in params:
        outs = convgru_layer(cur, wg, bg, wc, bc, cin, hid, with_gates=return_gates)
        hseq = outs[0]                                   # (t, b, h, w*hid)
        cur = hseq                                       # next layer input (lane-dense)
        hs5 = hseq.reshape(t, b, h, w, hid)
        layer_output_list.append(jnp.transpose(hs5, (1, 0, 4, 2, 3)))   # (b,t,hid,h,w)
        last_state_list.append(jnp.transpose(hs5[-1], (0, 3, 1, 2)))    # (b,hid,h,w)
        if return_gates:
            rs5 = outs[1].reshape(t, b, h, w, hid)
            us5 = outs[2].reshape(t, b, h, w, hid)
            layer_reset_list.append(jnp.transpose(rs5, (1, 0, 4, 2, 3)))
            layer_update_list.append(jnp.transpose(us5, (1, 0, 4, 2, 3)))
        cin = hid

    if not return_all_layers:
        layer_output_list = layer_output_list[-1:]
        layer_reset_list = layer_reset_list[-1:]
        layer_update_list = layer_update_list[-1:]
        last_state_list = last_state_list[-1:]
    return layer_output_list, layer_reset_list, layer_update_list, last_state_list


# ----------------------------------------------------------------------------
# Pure-JAX reference (correctness check only)
# ----------------------------------------------------------------------------
def ref_convgru(params, input_tensor, batch_first=False):
    if not batch_first:
        input_tensor = jnp.transpose(input_tensor, (1, 0, 2, 3, 4))
    b, t, c, h, w = input_tensor.shape
    cur = jnp.transpose(input_tensor, (1, 0, 3, 4, 2))  # (t,b,h,w,c)
    dn = ('NHWC', 'HWIO', 'NHWC')
    outs, rsts, upds = [], [], []
    for (wg, bg, wc, bc, hid) in params:
        hst = jnp.zeros((b, h, w, hid), jnp.float32)
        seq, rseq, useq = [], [], []
        for ti in range(cur.shape[0]):
            x = cur[ti]
            comb = jnp.concatenate([x, hst], axis=-1)
            g = lax.conv_general_dilated(comb, wg, (1, 1), 'SAME', dimension_numbers=dn,
                                         precision=lax.Precision.HIGHEST) + bg.reshape(1, 1, 1, -1)
            reset = jax.nn.sigmoid(g[..., :hid])
            update = jax.nn.sigmoid(g[..., hid:])
            comb2 = jnp.concatenate([x, reset * hst], axis=-1)
            cc = lax.conv_general_dilated(comb2, wc, (1, 1), 'SAME', dimension_numbers=dn,
                                          precision=lax.Precision.HIGHEST) + bc.reshape(1, 1, 1, -1)
            hst = (1.0 - update) * hst + update * jnp.tanh(cc)
            seq.append(hst); rseq.append(reset); useq.append(update)
        cur = jnp.stack(seq, axis=0)
        outs.append(jnp.transpose(cur, (1, 0, 4, 2, 3)))
        rsts.append(jnp.transpose(jnp.stack(rseq, 0), (1, 0, 4, 2, 3)))
        upds.append(jnp.transpose(jnp.stack(useq, 0), (1, 0, 4, 2, 3)))
    return outs, rsts, upds


# ----------------------------------------------------------------------------
if __name__ == "__main__":
    key = jax.random.PRNGKey(0)
    B, T, C, H, W = 2, 8, 4, 16, 16
    hidden_dims = [8, 8]            # W * hid = 128 -> exactly lane-dense outputs
    KH, KW = 3, 3

    keys = jax.random.split(key, 1 + 4 * len(hidden_dims))
    x = jax.random.normal(keys[0], (T, B, C, H, W), jnp.float32)  # (t,b,c,h,w), batch_first=False

    params = []
    cin = C
    ki = 1
    for hid in hidden_dims:
        wg = 0.1 * jax.random.normal(keys[ki + 0], (KH, KW, cin + hid, 2 * hid), jnp.float32)
        bg = 0.1 * jax.random.normal(keys[ki + 1], (1, 2 * hid), jnp.float32)
        wc = 0.1 * jax.random.normal(keys[ki + 2], (KH, KW, cin + hid, hid), jnp.float32)
        bc = 0.1 * jax.random.normal(keys[ki + 3], (1, hid), jnp.float32)
        params.append((wg, bg, wc, bc, hid))
        cin = hid
        ki += 4

    fwd = jax.jit(lambda xt: convgru_forward(params, xt, batch_first=False,
                                             return_all_layers=True, return_gates=True))
    outs, resets, updates, lasts = fwd(x)
    jax.block_until_ready(outs)
    jax.block_until_ready(lasts)

    # Sanity-check vs. a pure-JAX f32 reference.  Kernel matmul operands are
    # bf16 (f32 accumulation) and the recurrent state is re-quantized into the
    # matmul operand each step, so error grows mildly with T; 3e-2 at T=8.
    ref_outs, ref_rsts, ref_upds = ref_convgru(params, x, batch_first=False)
    for o, r in zip(outs, ref_outs):
        np.testing.assert_allclose(np.asarray(o), np.asarray(r), atol=3e-2, rtol=3e-2)
    for o, r in zip(resets, ref_rsts):
        np.testing.assert_allclose(np.asarray(o), np.asarray(r), atol=3e-2, rtol=3e-2)
    for o, r in zip(updates, ref_upds):
        np.testing.assert_allclose(np.asarray(o), np.asarray(r), atol=3e-2, rtol=3e-2)

    print("KERNEL_OK")
</pallas_src>

<mosaic_0001>
module attributes {stable_mosaic.version = 11 : i64} {
  func.func @kernel(%arg0: i32, %arg1: i32, %arg2: memref<1x2x16x192xbf16, #tpu.memory_space<vmem>>, %arg3: memref<192x384xbf16, #tpu.memory_space<vmem>>, %arg4: memref<384x256xbf16, #tpu.memory_space<vmem>>, %arg5: memref<384x128xbf16, #tpu.memory_space<vmem>>, %arg6: memref<1x256xf32, #tpu.memory_space<vmem>>, %arg7: memref<1x128xf32, #tpu.memory_space<vmem>>, %arg8: memref<1x2x16x128xf32, #tpu.memory_space<vmem>>, %arg9: memref<1x2x16x128xf32, #tpu.memory_space<vmem>>, %arg10: memref<1x2x16x128xf32, #tpu.memory_space<vmem>>, %arg11: memref<32x128xf32, #tpu.memory_space<vmem>>) attributes {dimension_semantics = [#tpu.dimension_semantics<parallel>, #tpu.dimension_semantics<arbitrary>], iteration_bounds = array<i64: 1, 8>, scalar_prefetch = 0 : i64, scratch_operands = 1 : i64, tpu.core_type = #tpu.core_type<tc>, window_params = [{transform_indices = @transform_0, window_bounds = array<i64: 1, 2, 16, 192>}, {pipeline_mode = #tpu.pipeline_mode<synchronous>, transform_indices = @transform_1, window_bounds = array<i64: 192, 384>}, {pipeline_mode = #tpu.pipeline_mode<synchronous>, transform_indices = @transform_2, window_bounds = array<i64: 384, 256>}, {pipeline_mode = #tpu.pipeline_mode<synchronous>, transform_indices = @transform_3, window_bounds = array<i64: 384, 128>}, {pipeline_mode = #tpu.pipeline_mode<synchronous>, transform_indices = @transform_4, window_bounds = array<i64: 1, 256>}, {pipeline_mode = #tpu.pipeline_mode<synchronous>, transform_indices = @transform_5, window_bounds = array<i64: 1, 128>}, {transform_indices = @transform_6, window_bounds = array<i64: 1, 2, 16, 128>}, {transform_indices = @transform_7, window_bounds = array<i64: 1, 2, 16, 128>}, {transform_indices = @transform_8, window_bounds = array<i64: 1, 2, 16, 128>}]} {
    %c0_i32 = arith.constant 0 : i32
    %0 = arith.cmpi eq, %arg1, %c0_i32 : i32
    %1 = arith.extui %0 : i1 to i32
    %c0_i32_0 = arith.constant 0 : i32
    %2 = arith.cmpi ne, %1, %c0_i32_0 : i32
    scf.if %2 {
      %cst_49 = arith.constant 0.000000e+00 : f32
      %96 = vector.broadcast %cst_49 : f32 to vector<32x128xf32>
      %c0_50 = arith.constant 0 : index
      %c0_51 = arith.constant 0 : index
      %97 = vector.load %arg11[%c0_50, %c0_51] : memref<32x128xf32, #tpu.memory_space<vmem>>, vector<32x128xf32>
      tpu.vector_store %arg11[%c0_50, %c0_51], %96 {strides = array<i32>} : memref<32x128xf32, #tpu.memory_space<vmem>>, vector<32x128xf32>,
    } else {
    }
    %c0 = arith.constant 0 : index
    %c0_1 = arith.constant 0 : index
    %3 = vector.load %arg11[%c0, %c0_1] : memref<32x128xf32, #tpu.memory_space<vmem>>, vector<32x128xf32>
    %4 = tpu.iota {dimensions = array<i32: 0>} : vector<32x128xi32>
    %c16_i32 = arith.constant 16 : i32
    %c0_i32_2 = arith.constant 0 : i32
    %5 = arith.cmpi eq, %c16_i32, %c0_i32_2 : i32
    %c1_i32 = arith.constant 1 : i32
    %6 = arith.select %5, %c1_i32, %c16_i32 : i32
    %7 = vector.broadcast %6 : i32 to vector<32x128xi32>
    %8 = arith.remsi %4, %7 : vector<32x128xi32>
    %c0_i32_3 = arith.constant 0 : i32
    %9 = vector.broadcast %c0_i32_3 : i32 to vector<32x128xi32>
    %10 = arith.cmpi ne, %8, %9 : vector<32x128xi32>
    %c0_i32_4 = arith.constant 0 : i32
    %11 = vector.broadcast %c0_i32_4 : i32 to vector<32x128xi32>
    %12 = arith.cmpi slt, %8, %11 : vector<32x128xi32>
    %c0_i32_5 = arith.constant 0 : i32
    %13 = arith.cmpi slt, %6, %c0_i32_5 : i32
    %14 = vector.broadcast %13 : i1 to vector<32x128xi1>
    %15 = vector.broadcast %14 : vector<32x128xi1> to vector<32x128xi1>
    %16 = arith.xori %12, %15 : vector<32x128xi1>
    %17 = arith.andi %16, %10 : vector<32x128xi1>
    %18 = vector.broadcast %6 : i32 to vector<32x128xi32>
    %19 = arith.addi %8, %18 : vector<32x128xi32>
    %20 = arith.select %17, %19, %8 : vector<32x128xi1>, vector<32x128xi32>
    %c0_6 = arith.constant 0 : index
    %c0_7 = arith.constant 0 : index
    %c0_8 = arith.constant 0 : index
    %c0_9 = arith.constant 0 : index
    %21 = vector.load %arg2[%c0_6, %c0_7, %c0_8, %c0_9] : memref<1x2x16x192xbf16, #tpu.memory_space<vmem>>, vector<1x2x16x192xbf16>
    %22 = vector.shape_cast %21 : vector<1x2x16x192xbf16> to vector<2x16x192xbf16>
    %23 = vector.shape_cast %22 : vector<2x16x192xbf16> to vector<32x192xbf16>
    %c0_10 = arith.constant 0 : index
    %c0_11 = arith.constant 0 : index
    %24 = vector.load %arg3[%c0_10, %c0_11] : memref<192x384xbf16, #tpu.memory_space<vmem>>, vector<192x384xbf16>
    %cst = arith.constant dense<0.000000e+00> : vector<32x384xf32>
    %25 = tpu.matmul %23, %24, %cst {dimension_numbers = #tpu.dot_dimension_numbers<[1], [0], [0], [1], [0, 0, 1, 1], [], []>} : vector<32x192xbf16>, vector<192x384xbf16>, vector<32x384xf32> -> vector<32x384xf32>
    %c1_i32_12 = arith.constant 1 : i32
    %26 = tpu.dynamic_rotate %3 by %c1_i32_12 dim 0 : vector<32x128xf32>, i32 -> vector<32x128xf32>
    %c1_i32_13 = arith.constant 1 : i32
    %27 = vector.broadcast %c1_i32_13 : i32 to vector<32x128xi32>
    %28 = arith.cmpi sge, %20, %27 : vector<32x128xi32>
    %cst_14 = arith.constant 0.000000e+00 : f32
    %29 = vector.broadcast %cst_14 : f32 to vector<32x128xf32>
    %30 = arith.select %28, %26, %29 : vector<32x128xi1>, vector<32x128xf32>
    %c31_i32 = arith.constant 31 : i32
    %31 = tpu.dynamic_rotate %3 by %c31_i32 dim 0 : vector<32x128xf32>, i32 -> vector<32x128xf32>
    %c15_i32 = arith.constant 15 : i32
    %32 = vector.broadcast %c15_i32 : i32 to vector<32x128xi32>
    %33 = arith.cmpi slt, %20, %32 : vector<32x128xi32>
    %cst_15 = arith.constant 0.000000e+00 : f32
    %34 = vector.broadcast %cst_15 : f32 to vector<32x128xf32>
    %35 = arith.select %33, %31, %34 : vector<32x128xi1>, vector<32x128xf32>
    %36 = tpu.concatenate %30, %3, %35 in 1 : vector<32x128xf32>, vector<32x128xf32>, vector<32x128xf32> -> vector<32x384xf32>
    %37 = arith.truncf %36 : vector<32x384xf32> to vector<32x384xbf16>
    %38 = vector.extract_strided_slice %25 {offsets = [0, 0], sizes = [32, 256], strides = [1, 1]} : vector<32x384xf32> to vector<32x256xf32>
    %c0_16 = arith.constant 0 : index
    %c0_17 = arith.constant 0 : index
    %39 = vector.load %arg4[%c0_16, %c0_17] : memref<384x256xbf16, #tpu.memory_space<vmem>>, vector<384x256xbf16>
    %cst_18 = arith.constant dense<0.000000e+00> : vector<32x256xf32>
    %40 = tpu.matmul %37, %39, %cst_18 {dimension_numbers = #tpu.dot_dimension_numbers<[1], [0], [0], [1], [0, 0, 1, 1], [], []>} : vector<32x384xbf16>, vector<384x256xbf16>, vector<32x256xf32> -> vector<32x256xf32>
    %41 = arith.addf %38, %40 : vector<32x256xf32>
    %c0_19 = arith.constant 0 : index
    %c0_20 = arith.constant 0 : index
    %42 = vector.load %arg6[%c0_19, %c0_20] : memref<1x256xf32, #tpu.memory_space<vmem>>, vector<1x256xf32>
    %43 = vector.broadcast %42 : vector<1x256xf32> to vector<32x256xf32>
    %44 = arith.addf %41, %43 : vector<32x256xf32>
    %45 = vector.extract_strided_slice %44 {offsets = [0, 0], sizes = [32, 128], strides = [1, 1]} : vector<32x256xf32> to vector<32x128xf32>
    %46 = arith.negf %45 : vector<32x128xf32>
    %47 = math.exp %46 : vector<32x128xf32>
    %cst_21 = arith.constant 1.000000e+00 : f32
    %48 = vector.broadcast %cst_21 : f32 to vector<32x128xf32>
    %49 = arith.addf %48, %47 : vector<32x128xf32>
    %50 = arith.divf %48, %49 : vector<32x128xf32>
    %51 = vector.extract_strided_slice %44 {offsets = [0, 128], sizes = [32, 128], strides = [1, 1]} : vector<32x256xf32> to vector<32x128xf32>
    %52 = arith.negf %51 : vector<32x128xf32>
    %53 = math.exp %52 : vector<32x128xf32>
    %cst_22 = arith.constant 1.000000e+00 : f32
    %54 = vector.broadcast %cst_22 : f32 to vector<32x128xf32>
    %55 = arith.addf %54, %53 : vector<32x128xf32>
    %56 = arith.divf %54, %55 : vector<32x128xf32>
    %57 = arith.mulf %50, %3 : vector<32x128xf32>
    %c1_i32_23 = arith.constant 1 : i32
    %58 = tpu.dynamic_rotate %57 by %c1_i32_23 dim 0 : vector<32x128xf32>, i32 -> vector<32x128xf32>
    %c1_i32_24 = arith.constant 1 : i32
    %59 = vector.broadcast %c1_i32_24 : i32 to vector<32x128xi32>
    %60 = arith.cmpi sge, %20, %59 : vector<32x128xi32>
    %cst_25 = arith.constant 0.000000e+00 : f32
    %61 = vector.broadcast %cst_25 : f32 to vector<32x128xf32>
    %62 = arith.select %60, %58, %61 : vector<32x128xi1>, vector<32x128xf32>
    %c31_i32_26 = arith.constant 31 : i32
    %63 = tpu.dynamic_rotate %57 by %c31_i32_26 dim 0 : vector<32x128xf32>, i32 -> vector<32x128xf32>
    %c15_i32_27 = arith.constant 15 : i32
    %64 = vector.broadcast %c15_i32_27 : i32 to vector<32x128xi32>
    %65 = arith.cmpi slt, %20, %64 : vector<32x128xi32>
    %cst_28 = arith.constant 0.000000e+00 : f32
    %66 = vector.broadcast %cst_28 : f32 to vector<32x128xf32>
    %67 = arith.select %65, %63, %66 : vector<32x128xi1>, vector<32x128xf32>
    %68 = tpu.concatenate %62, %57, %67 in 1 : vector<32x128xf32>, vector<32x128xf32>, vector<32x128xf32> -> vector<32x384xf32>
    %69 = arith.truncf %68 : vector<32x384xf32> to vector<32x384xbf16>
    %70 = vector.extract_strided_slice %25 {offsets = [0, 256], sizes = [32, 128], strides = [1, 1]} : vector<32x384xf32> to vector<32x128xf32>
    %c0_29 = arith.constant 0 : index
    %c0_30 = arith.constant 0 : index
    %71 = vector.load %arg5[%c0_29, %c0_30] : memref<384x128xbf16, #tpu.memory_space<vmem>>, vector<384x128xbf16>
    %cst_31 = arith.constant dense<0.000000e+00> : vector<32x128xf32>
    %72 = tpu.matmul %69, %71, %cst_31 {dimension_numbers = #tpu.dot_dimension_numbers<[1], [0], [0], [1], [0, 0, 1, 1], [], []>} : vector<32x384xbf16>, vector<384x128xbf16>, vector<32x128xf32> -> vector<32x128xf32>
    %73 = arith.addf %70, %72 : vector<32x128xf32>
    %c0_32 = arith.constant 0 : index
    %c0_33 = arith.constant 0 : index
    %74 = vector.load %arg7[%c0_32, %c0_33] : memref<1x128xf32, #tpu.memory_space<vmem>>, vector<1x128xf32>
    %75 = vector.broadcast %74 : vector<1x128xf32> to vector<32x128xf32>
    %76 = arith.addf %73, %75 : vector<32x128xf32>
    %77 = math.tanh %76 : vector<32x128xf32>
    %cst_34 = arith.constant 1.000000e+00 : f32
    %78 = vector.broadcast %cst_34 : f32 to vector<32x128xf32>
    %79 = arith.subf %78, %56 : vector<32x128xf32>
    %80 = arith.mulf %79, %3 : vector<32x128xf32>
    %81 = arith.mulf %56, %77 : vector<32x128xf32>
    %82 = arith.addf %80, %81 : vector<32x128xf32>
    %c0_35 = arith.constant 0 : index
    %c0_36 = arith.constant 0 : index
    %83 = vector.load %arg11[%c0_35, %c0_36] : memref<32x128xf32, #tpu.memory_space<vmem>>, vector<32x128xf32>
    tpu.vector_store %arg11[%c0_35, %c0_36], %82 {strides = array<i32>} : memref<32x128xf32, #tpu.memory_space<vmem>>, vector<32x128xf32>,
    %84 = vector.shape_cast %82 : vector<32x128xf32> to vector<2x16x128xf32>
    %c0_37 = arith.constant 0 : index
    %c0_38 = arith.constant 0 : index
    %c0_39 = arith.constant 0 : index
    %c0_40 = arith.constant 0 : index
    %85 = vector.load %arg8[%c0_37, %c0_38, %c0_39, %c0_40] : memref<1x2x16x128xf32, #tpu.memory_space<vmem>>, vector<1x2x16x128xf32>
    %86 = vector.shape_cast %85 : vector<1x2x16x128xf32> to vector<2x16x128xf32>
    %87 = vector.shape_cast %84 : vector<2x16x128xf32> to vector<1x2x16x128xf32>
    tpu.vector_store %arg8[%c0_37, %c0_38, %c0_39, %c0_40], %87 {strides = array<i32>} : memref<1x2x16x128xf32, #tpu.memory_space<vmem>>, vector<1x2x16x128xf32>,
    %88 = vector.shape_cast %50 : vector<32x128xf32> to vector<2x16x128xf32>
    %c0_41 = arith.constant 0 : index
    %c0_42 = arith.constant 0 : index
    %c0_43 = arith.constant 0 : index
    %c0_44 = arith.constant 0 : index
    %89 = vector.load %arg9[%c0_41, %c0_42, %c0_43, %c0_44] : memref<1x2x16x128xf32, #tpu.memory_space<vmem>>, vector<1x2x16x128xf32>
    %90 = vector.shape_cast %89 : vector<1x2x16x128xf32> to vector<2x16x128xf32>
    %91 = vector.shape_cast %88 : vector<2x16x128xf32> to vector<1x2x16x128xf32>
    tpu.vector_store %arg9[%c0_41, %c0_42, %c0_43, %c0_44], %91 {strides = array<i32>} : memref<1x2x16x128xf32, #tpu.memory_space<vmem>>, vector<1x2x16x128xf32>,
    %92 = vector.shape_cast %56 : vector<32x128xf32> to vector<2x16x128xf32>
    %c0_45 = arith.constant 0 : index
    %c0_46 = arith.constant 0 : index
    %c0_47 = arith.constant 0 : index
    %c0_48 = arith.constant 0 : index
    %93 = vector.load %arg10[%c0_45, %c0_46, %c0_47, %c0_48] : memref<1x2x16x128xf32, #tpu.memory_space<vmem>>, vector<1x2x16x128xf32>
    %94 = vector.shape_cast %93 : vector<1x2x16x128xf32> to vector<2x16x128xf32>
    %95 = vector.shape_cast %92 : vector<2x16x128xf32> to vector<1x2x16x128xf32>
    tpu.vector_store %arg10[%c0_45, %c0_46, %c0_47, %c0_48], %95 {strides = array<i32>} : memref<1x2x16x128xf32, #tpu.memory_space<vmem>>, vector<1x2x16x128xf32>,
    return
  }
  func.func @transform_0(%arg0: i32, %arg1: i32) -> (i32, i32, i32, i32) {
    %c0_i32 = arith.constant 0 : i32
    %c0_i32_0 = arith.constant 0 : i32
    %c0_i32_1 = arith.constant 0 : i32
    return %arg1, %arg0, %c0_i32, %c0_i32_0 : i32, i32, i32, i32
  }
  func.func @transform_1(%arg0: i32, %arg1: i32) -> (i32, i32) {
    %c0_i32 = arith.constant 0 : i32
    %c0_i32_0 = arith.constant 0 : i32
    %c0_i32_1 = arith.constant 0 : i32
    return %c0_i32, %c0_i32_0 : i32, i32
  }
  func.func @transform_2(%arg0: i32, %arg1: i32) -> (i32, i32) {
    %c0_i32 = arith.constant 0 : i32
    %c0_i32_0 = arith.constant 0 : i32
    %c0_i32_1 = arith.constant 0 : i32
    return %c0_i32, %c0_i32_0 : i32, i32
  }
  func.func @transform_3(%arg0: i32, %arg1: i32) -> (i32, i32) {
    %c0_i32 = arith.constant 0 : i32
    %c0_i32_0 = arith.constant 0 : i32
    %c0_i32_1 = arith.constant 0 : i32
    return %c0_i32, %c0_i32_0 : i32, i32
  }
  func.func @transform_4(%arg0: i32, %arg1: i32) -> (i32, i32) {
    %c0_i32 = arith.constant 0 : i32
    %c0_i32_0 = arith.constant 0 : i32
    %c0_i32_1 = arith.constant 0 : i32
    return %c0_i32, %c0_i32_0 : i32, i32
  }
  func.func @transform_5(%arg0: i32, %arg1: i32) -> (i32, i32) {
    %c0_i32 = arith.constant 0 : i32
    %c0_i32_0 = arith.constant 0 : i32
    %c0_i32_1 = arith.constant 0 : i32
    return %c0_i32, %c0_i32_0 : i32, i32
  }
  func.func @transform_6(%arg0: i32, %arg1: i32) -> (i32, i32, i32, i32) {
    %c0_i32 = arith.constant 0 : i32
    %c0_i32_0 = arith.constant 0 : i32
    %c0_i32_1 = arith.constant 0 : i32
    return %arg1, %arg0, %c0_i32, %c0_i32_0 : i32, i32, i32, i32
  }
  func.func @transform_7(%arg0: i32, %arg1: i32) -> (i32, i32, i32, i32) {
    %c0_i32 = arith.constant 0 : i32
    %c0_i32_0 = arith.constant 0 : i32
    %c0_i32_1 = arith.constant 0 : i32
    return %arg1, %arg0, %c0_i32, %c0_i32_0 : i32, i32, i32, i32
  }
  func.func @transform_8(%arg0: i32, %arg1: i32) -> (i32, i32, i32, i32) {
    %c0_i32 = arith.constant 0 : i32
    %c0_i32_0 = arith.constant 0 : i32
    %c0_i32_1 = arith.constant 0 : i32
    return %arg1, %arg0, %c0_i32, %c0_i32_0 : i32, i32, i32, i32
  }
}

module attributes {stable_mosaic.version = 11 : i64} {
  func.func @kernel(%arg0: i32, %arg1: i32, %arg2: memref<1x2x16x384xbf16, #tpu.memory_space<vmem>>, %arg3: memref<384x384xbf16, #tpu.memory_space<vmem>>, %arg4: memref<384x256xbf16, #tpu.memory_space<vmem>>, %arg5: memref<384x128xbf16, #tpu.memory_space<vmem>>, %arg6: memref<1x256xf32, #tpu.memory_space<vmem>>, %arg7: memref<1x128xf32, #tpu.memory_space<vmem>>, %arg8: memref<1x2x16x128xf32, #tpu.memory_space<vmem>>, %arg9: memref<1x2x16x128xf32, #tpu.memory_space<vmem>>, %arg10: memref<1x2x16x128xf32, #tpu.memory_space<vmem>>, %arg11: memref<32x128xf32, #tpu.memory_space<vmem>>) attributes {dimension_semantics = [#tpu.dimension_semantics<parallel>, #tpu.dimension_semantics<arbitrary>], iteration_bounds = array<i64: 1, 8>, scalar_prefetch = 0 : i64, scratch_operands = 1 : i64, tpu.core_type = #tpu.core_type<tc>, window_params = [{transform_indices = @transform_0, window_bounds = array<i64: 1, 2, 16, 384>}, {pipeline_mode = #tpu.pipeline_mode<synchronous>, transform_indices = @transform_1, window_bounds = array<i64: 384, 384>}, {pipeline_mode = #tpu.pipeline_mode<synchronous>, transform_indices = @transform_2, window_bounds = array<i64: 384, 256>}, {pipeline_mode = #tpu.pipeline_mode<synchronous>, transform_indices = @transform_3, window_bounds = array<i64: 384, 128>}, {pipeline_mode = #tpu.pipeline_mode<synchronous>, transform_indices = @transform_4, window_bounds = array<i64: 1, 256>}, {pipeline_mode = #tpu.pipeline_mode<synchronous>, transform_indices = @transform_5, window_bounds = array<i64: 1, 128>}, {transform_indices = @transform_6, window_bounds = array<i64: 1, 2, 16, 128>}, {transform_indices = @transform_7, window_bounds = array<i64: 1, 2, 16, 128>}, {transform_indices = @transform_8, window_bounds = array<i64: 1, 2, 16, 128>}]} {
    %c0_i32 = arith.constant 0 : i32
    %0 = arith.cmpi eq, %arg1, %c0_i32 : i32
    %1 = arith.extui %0 : i1 to i32
    %c0_i32_0 = arith.constant 0 : i32
    %2 = arith.cmpi ne, %1, %c0_i32_0 : i32
    scf.if %2 {
      %cst_49 = arith.constant 0.000000e+00 : f32
      %96 = vector.broadcast %cst_49 : f32 to vector<32x128xf32>
      %c0_50 = arith.constant 0 : index
      %c0_51 = arith.constant 0 : index
      %97 = vector.load %arg11[%c0_50, %c0_51] : memref<32x128xf32, #tpu.memory_space<vmem>>, vector<32x128xf32>
      tpu.vector_store %arg11[%c0_50, %c0_51], %96 {strides = array<i32>} : memref<32x128xf32, #tpu.memory_space<vmem>>, vector<32x128xf32>,
    } else {
    }
    %c0 = arith.constant 0 : index
    %c0_1 = arith.constant 0 : index
    %3 = vector.load %arg11[%c0, %c0_1] : memref<32x128xf32, #tpu.memory_space<vmem>>, vector<32x128xf32>
    %4 = tpu.iota {dimensions = array<i32: 0>} : vector<32x128xi32>
    %c16_i32 = arith.constant 16 : i32
    %c0_i32_2 = arith.constant 0 : i32
    %5 = arith.cmpi eq, %c16_i32, %c0_i32_2 : i32
    %c1_i32 = arith.constant 1 : i32
    %6 = arith.select %5, %c1_i32, %c16_i32 : i32
    %7 = vector.broadcast %6 : i32 to vector<32x128xi32>
    %8 = arith.remsi %4, %7 : vector<32x128xi32>
    %c0_i32_3 = arith.constant 0 : i32
    %9 = vector.broadcast %c0_i32_3 : i32 to vector<32x128xi32>
    %10 = arith.cmpi ne, %8, %9 : vector<32x128xi32>
    %c0_i32_4 = arith.constant 0 : i32
    %11 = vector.broadcast %c0_i32_4 : i32 to vector<32x128xi32>
    %12 = arith.cmpi slt, %8, %11 : vector<32x128xi32>
    %c0_i32_5 = arith.constant 0 : i32
    %13 = arith.cmpi slt, %6, %c0_i32_5 : i32
    %14 = vector.broadcast %13 : i1 to vector<32x128xi1>
    %15 = vector.broadcast %14 : vector<32x128xi1> to vector<32x128xi1>
    %16 = arith.xori %12, %15 : vector<32x128xi1>
    %17 = arith.andi %16, %10 : vector<32x128xi1>
    %18 = vector.broadcast %6 : i32 to vector<32x128xi32>
    %19 = arith.addi %8, %18 : vector<32x128xi32>
    %20 = arith.select %17, %19, %8 : vector<32x128xi1>, vector<32x128xi32>
    %c0_6 = arith.constant 0 : index
    %c0_7 = arith.constant 0 : index
    %c0_8 = arith.constant 0 : index
    %c0_9 = arith.constant 0 : index
    %21 = vector.load %arg2[%c0_6, %c0_7, %c0_8, %c0_9] : memref<1x2x16x384xbf16, #tpu.memory_space<vmem>>, vector<1x2x16x384xbf16>
    %22 = vector.shape_cast %21 : vector<1x2x16x384xbf16> to vector<2x16x384xbf16>
    %23 = vector.shape_cast %22 : vector<2x16x384xbf16> to vector<32x384xbf16>
    %c0_10 = arith.constant 0 : index
    %c0_11 = arith.constant 0 : index
    %24 = vector.load %arg3[%c0_10, %c0_11] : memref<384x384xbf16, #tpu.memory_space<vmem>>, vector<384x384xbf16>
    %cst = arith.constant dense<0.000000e+00> : vector<32x384xf32>
    %25 = tpu.matmul %23, %24, %cst {dimension_numbers = #tpu.dot_dimension_numbers<[1], [0], [0], [1], [0, 0, 1, 1], [], []>} : vector<32x384xbf16>, vector<384x384xbf16>, vector<32x384xf32> -> vector<32x384xf32>
    %c1_i32_12 = arith.constant 1 : i32
    %26 = tpu.dynamic_rotate %3 by %c1_i32_12 dim 0 : vector<32x128xf32>, i32 -> vector<32x128xf32>
    %c1_i32_13 = arith.constant 1 : i32
    %27 = vector.broadcast %c1_i32_13 : i32 to vector<32x128xi32>
    %28 = arith.cmpi sge, %20, %27 : vector<32x128xi32>
    %cst_14 = arith.constant 0.000000e+00 : f32
    %29 = vector.broadcast %cst_14 : f32 to vector<32x128xf32>
    %30 = arith.select %28, %26, %29 : vector<32x128xi1>, vector<32x128xf32>
    %c31_i32 = arith.constant 31 : i32
    %31 = tpu.dynamic_rotate %3 by %c31_i32 dim 0 : vector<32x128xf32>, i32 -> vector<32x128xf32>
    %c15_i32 = arith.constant 15 : i32
    %32 = vector.broadcast %c15_i32 : i32 to vector<32x128xi32>
    %33 = arith.cmpi slt, %20, %32 : vector<32x128xi32>
    %cst_15 = arith.constant 0.000000e+00 : f32
    %34 = vector.broadcast %cst_15 : f32 to vector<32x128xf32>
    %35 = arith.select %33, %31, %34 : vector<32x128xi1>, vector<32x128xf32>
    %36 = tpu.concatenate %30, %3, %35 in 1 : vector<32x128xf32>, vector<32x128xf32>, vector<32x128xf32> -> vector<32x384xf32>
    %37 = arith.truncf %36 : vector<32x384xf32> to vector<32x384xbf16>
    %38 = vector.extract_strided_slice %25 {offsets = [0, 0], sizes = [32, 256], strides = [1, 1]} : vector<32x384xf32> to vector<32x256xf32>
    %c0_16 = arith.constant 0 : index
    %c0_17 = arith.constant 0 : index
    %39 = vector.load %arg4[%c0_16, %c0_17] : memref<384x256xbf16, #tpu.memory_space<vmem>>, vector<384x256xbf16>
    %cst_18 = arith.constant dense<0.000000e+00> : vector<32x256xf32>
    %40 = tpu.matmul %37, %39, %cst_18 {dimension_numbers = #tpu.dot_dimension_numbers<[1], [0], [0], [1], [0, 0, 1, 1], [], []>} : vector<32x384xbf16>, vector<384x256xbf16>, vector<32x256xf32> -> vector<32x256xf32>
    %41 = arith.addf %38, %40 : vector<32x256xf32>
    %c0_19 = arith.constant 0 : index
    %c0_20 = arith.constant 0 : index
    %42 = vector.load %arg6[%c0_19, %c0_20] : memref<1x256xf32, #tpu.memory_space<vmem>>, vector<1x256xf32>
    %43 = vector.broadcast %42 : vector<1x256xf32> to vector<32x256xf32>
    %44 = arith.addf %41, %43 : vector<32x256xf32>
    %45 = vector.extract_strided_slice %44 {offsets = [0, 0], sizes = [32, 128], strides = [1, 1]} : vector<32x256xf32> to vector<32x128xf32>
    %46 = arith.negf %45 : vector<32x128xf32>
    %47 = math.exp %46 : vector<32x128xf32>
    %cst_21 = arith.constant 1.000000e+00 : f32
    %48 = vector.broadcast %cst_21 : f32 to vector<32x128xf32>
    %49 = arith.addf %48, %47 : vector<32x128xf32>
    %50 = arith.divf %48, %49 : vector<32x128xf32>
    %51 = vector.extract_strided_slice %44 {offsets = [0, 128], sizes = [32, 128], strides = [1, 1]} : vector<32x256xf32> to vector<32x128xf32>
    %52 = arith.negf %51 : vector<32x128xf32>
    %53 = math.exp %52 : vector<32x128xf32>
    %cst_22 = arith.constant 1.000000e+00 : f32
    %54 = vector.broadcast %cst_22 : f32 to vector<32x128xf32>
    %55 = arith.addf %54, %53 : vector<32x128xf32>
    %56 = arith.divf %54, %55 : vector<32x128xf32>
    %57 = arith.mulf %50, %3 : vector<32x128xf32>
    %c1_i32_23 = arith.constant 1 : i32
    %58 = tpu.dynamic_rotate %57 by %c1_i32_23 dim 0 : vector<32x128xf32>, i32 -> vector<32x128xf32>
    %c1_i32_24 = arith.constant 1 : i32
    %59 = vector.broadcast %c1_i32_24 : i32 to vector<32x128xi32>
    %60 = arith.cmpi sge, %20, %59 : vector<32x128xi32>
    %cst_25 = arith.constant 0.000000e+00 : f32
    %61 = vector.broadcast %cst_25 : f32 to vector<32x128xf32>
    %62 = arith.select %60, %58, %61 : vector<32x128xi1>, vector<32x128xf32>
    %c31_i32_26 = arith.constant 31 : i32
    %63 = tpu.dynamic_rotate %57 by %c31_i32_26 dim 0 : vector<32x128xf32>, i32 -> vector<32x128xf32>
    %c15_i32_27 = arith.constant 15 : i32
    %64 = vector.broadcast %c15_i32_27 : i32 to vector<32x128xi32>
    %65 = arith.cmpi slt, %20, %64 : vector<32x128xi32>
    %cst_28 = arith.constant 0.000000e+00 : f32
    %66 = vector.broadcast %cst_28 : f32 to vector<32x128xf32>
    %67 = arith.select %65, %63, %66 : vector<32x128xi1>, vector<32x128xf32>
    %68 = tpu.concatenate %62, %57, %67 in 1 : vector<32x128xf32>, vector<32x128xf32>, vector<32x128xf32> -> vector<32x384xf32>
    %69 = arith.truncf %68 : vector<32x384xf32> to vector<32x384xbf16>
    %70 = vector.extract_strided_slice %25 {offsets = [0, 256], sizes = [32, 128], strides = [1, 1]} : vector<32x384xf32> to vector<32x128xf32>
    %c0_29 = arith.constant 0 : index
    %c0_30 = arith.constant 0 : index
    %71 = vector.load %arg5[%c0_29, %c0_30] : memref<384x128xbf16, #tpu.memory_space<vmem>>, vector<384x128xbf16>
    %cst_31 = arith.constant dense<0.000000e+00> : vector<32x128xf32>
    %72 = tpu.matmul %69, %71, %cst_31 {dimension_numbers = #tpu.dot_dimension_numbers<[1], [0], [0], [1], [0, 0, 1, 1], [], []>} : vector<32x384xbf16>, vector<384x128xbf16>, vector<32x128xf32> -> vector<32x128xf32>
    %73 = arith.addf %70, %72 : vector<32x128xf32>
    %c0_32 = arith.constant 0 : index
    %c0_33 = arith.constant 0 : index
    %74 = vector.load %arg7[%c0_32, %c0_33] : memref<1x128xf32, #tpu.memory_space<vmem>>, vector<1x128xf32>
    %75 = vector.broadcast %74 : vector<1x128xf32> to vector<32x128xf32>
    %76 = arith.addf %73, %75 : vector<32x128xf32>
    %77 = math.tanh %76 : vector<32x128xf32>
    %cst_34 = arith.constant 1.000000e+00 : f32
    %78 = vector.broadcast %cst_34 : f32 to vector<32x128xf32>
    %79 = arith.subf %78, %56 : vector<32x128xf32>
    %80 = arith.mulf %79, %3 : vector<32x128xf32>
    %81 = arith.mulf %56, %77 : vector<32x128xf32>
    %82 = arith.addf %80, %81 : vector<32x128xf32>
    %c0_35 = arith.constant 0 : index
    %c0_36 = arith.constant 0 : index
    %83 = vector.load %arg11[%c0_35, %c0_36] : memref<32x128xf32, #tpu.memory_space<vmem>>, vector<32x128xf32>
    tpu.vector_store %arg11[%c0_35, %c0_36], %82 {strides = array<i32>} : memref<32x128xf32, #tpu.memory_space<vmem>>, vector<32x128xf32>,
    %84 = vector.shape_cast %82 : vector<32x128xf32> to vector<2x16x128xf32>
    %c0_37 = arith.constant 0 : index
    %c0_38 = arith.constant 0 : index
    %c0_39 = arith.constant 0 : index
    %c0_40 = arith.constant 0 : index
    %85 = vector.load %arg8[%c0_37, %c0_38, %c0_39, %c0_40] : memref<1x2x16x128xf32, #tpu.memory_space<vmem>>, vector<1x2x16x128xf32>
    %86 = vector.shape_cast %85 : vector<1x2x16x128xf32> to vector<2x16x128xf32>
    %87 = vector.shape_cast %84 : vector<2x16x128xf32> to vector<1x2x16x128xf32>
    tpu.vector_store %arg8[%c0_37, %c0_38, %c0_39, %c0_40], %87 {strides = array<i32>} : memref<1x2x16x128xf32, #tpu.memory_space<vmem>>, vector<1x2x16x128xf32>,
    %88 = vector.shape_cast %50 : vector<32x128xf32> to vector<2x16x128xf32>
    %c0_41 = arith.constant 0 : index
    %c0_42 = arith.constant 0 : index
    %c0_43 = arith.constant 0 : index
    %c0_44 = arith.constant 0 : index
    %89 = vector.load %arg9[%c0_41, %c0_42, %c0_43, %c0_44] : memref<1x2x16x128xf32, #tpu.memory_space<vmem>>, vector<1x2x16x128xf32>
    %90 = vector.shape_cast %89 : vector<1x2x16x128xf32> to vector<2x16x128xf32>
    %91 = vector.shape_cast %88 : vector<2x16x128xf32> to vector<1x2x16x128xf32>
    tpu.vector_store %arg9[%c0_41, %c0_42, %c0_43, %c0_44], %91 {strides = array<i32>} : memref<1x2x16x128xf32, #tpu.memory_space<vmem>>, vector<1x2x16x128xf32>,
    %92 = vector.shape_cast %56 : vector<32x128xf32> to vector<2x16x128xf32>
    %c0_45 = arith.constant 0 : index
    %c0_46 = arith.constant 0 : index
    %c0_47 = arith.constant 0 : index
    %c0_48 = arith.constant 0 : index
    %93 = vector.load %arg10[%c0_45, %c0_46, %c0_47, %c0_48] : memref<1x2x16x128xf32, #tpu.memory_space<vmem>>, vector<1x2x16x128xf32>
    %94 = vector.shape_cast %93 : vector<1x2x16x128xf32> to vector<2x16x128xf32>
    %95 = vector.shape_cast %92 : vector<2x16x128xf32> to vector<1x2x16x128xf32>
    tpu.vector_store %arg10[%c0_45, %c0_46, %c0_47, %c0_48], %95 {strides = array<i32>} : memref<1x2x16x128xf32, #tpu.memory_space<vmem>>, vector<1x2x16x128xf32>,
    return
  }
  func.func @transform_0(%arg0: i32, %arg1: i32) -> (i32, i32, i32, i32) {
    %c0_i32 = arith.constant 0 : i32
    %c0_i32_0 = arith.constant 0 : i32
    %c0_i32_1 = arith.constant 0 : i32
    return %arg1, %arg0, %c0_i32, %c0_i32_0 : i32, i32, i32, i32
  }
  func.func @transform_1(%arg0: i32, %arg1: i32) -> (i32, i32) {
    %c0_i32 = arith.constant 0 : i32
    %c0_i32_0 = arith.constant 0 : i32
    %c0_i32_1 = arith.constant 0 : i32
    return %c0_i32, %c0_i32_0 : i32, i32
  }
  func.func @transform_2(%arg0: i32, %arg1: i32) -> (i32, i32) {
    %c0_i32 = arith.constant 0 : i32
    %c0_i32_0 = arith.constant 0 : i32
    %c0_i32_1 = arith.constant 0 : i32
    return %c0_i32, %c0_i32_0 : i32, i32
  }
  func.func @transform_3(%arg0: i32, %arg1: i32) -> (i32, i32) {
    %c0_i32 = arith.constant 0 : i32
    %c0_i32_0 = arith.constant 0 : i32
    %c0_i32_1 = arith.constant 0 : i32
    return %c0_i32, %c0_i32_0 : i32, i32
  }
  func.func @transform_4(%arg0: i32, %arg1: i32) -> (i32, i32) {
    %c0_i32 = arith.constant 0 : i32
    %c0_i32_0 = arith.constant 0 : i32
    %c0_i32_1 = arith.constant 0 : i32
    return %c0_i32, %c0_i32_0 : i32, i32
  }
  func.func @transform_5(%arg0: i32, %arg1: i32) -> (i32, i32) {
    %c0_i32 = arith.constant 0 : i32
    %c0_i32_0 = arith.constant 0 : i32
    %c0_i32_1 = arith.constant 0 : i32
    return %c0_i32, %c0_i32_0 : i32, i32
  }
  func.func @transform_6(%arg0: i32, %arg1: i32) -> (i32, i32, i32, i32) {
    %c0_i32 = arith.constant 0 : i32
    %c0_i32_0 = arith.constant 0 : i32
    %c0_i32_1 = arith.constant 0 : i32
    return %arg1, %arg0, %c0_i32, %c0_i32_0 : i32, i32, i32, i32
  }
  func.func @transform_7(%arg0: i32, %arg1: i32) -> (i32, i32, i32, i32) {
    %c0_i32 = arith.constant 0 : i32
    %c0_i32_0 = arith.constant 0 : i32
    %c0_i32_1 = arith.constant 0 : i32
    return %arg1, %arg0, %c0_i32, %c0_i32_0 : i32, i32, i32, i32
  }
  func.func @transform_8(%arg0: i32, %arg1: i32) -> (i32, i32, i32, i32) {
    %c0_i32 = arith.constant 0 : i32
    %c0_i32_0 = arith.constant 0 : i32
    %c0_i32_1 = arith.constant 0 : i32
    return %arg1, %arg0, %c0_i32, %c0_i32_0 : i32, i32, i32, i32
  }
}

</mosaic_0001>

<bundles_post_ra>
// kernel: _lambda_.2
= control target key start
LH: loop header
LB: loop body
LE: loop exit
PB: predicated region body
PF: predicated region fallthrough
CT: control target
= control target key end

     0   :  { %s2463_s27 = smov 0   ;;  %s2465_s28 = smov 0   ;;  %s3020_s0 = inlined_call_operand.vmem [shape: bf16[8,2,16,192], index: 0, kind: input, shape index: {}]   ;;  %s3021_s1 = inlined_call_operand.vmem [shape: bf16[192,384], index: 1, kind: input, shape index: {}]   ;;  %s3022_s2 = inlined_call_operand.vmem [shape: bf16[384,256], index: 2, kind: input, shape index: {}]   ;;  %s3023_s3 = inlined_call_operand.vmem [shape: bf16[384,128], index: 3, kind: input, shape index: {}]   ;;  %s3024_s4 = inlined_call_operand.vmem [shape: f32[1,256], index: 4, kind: input, shape index: {}]   ;;  %s3025_s5 = inlined_call_operand.vmem [shape: f32[1,128], index: 5, kind: input, shape index: {}]   ;;  %s3026_s6 = inlined_call_operand.vmem [shape: f32[8,2,16,128], index: 6, kind: output, shape index: {0}]   ;;  %s3027_s7 = inlined_call_operand.vmem [shape: f32[8,2,16,128], index: 7, kind: output, shape index: {1}]   ;;  %s3028_s8 = inlined_call_operand.vmem [shape: f32[8,2,16,128], index: 8, kind: output, shape index: {2}]  }
   0x1   :  { %s2467_s29 = smov 0  }
   0x2 LB: > { %s28_s30 = sadd.s32 1, %s2409_s28  ;;  %p1935_p0 = scmp.ge.s32.totalorder %s2413_s29, 1  ;;  %s2413_s29 = sphi %s2467_s29, %s19_s29   ;;  %s2409_s28 = sphi %s2465_s28, %s3038_s28   ;;  %s2405_s27 = sphi %s2463_s27, %s3037_s27  }
   0x3   : > { %p29_p1 = scmp.ge.s32.totalorder %s28_s30, 8  ;;  %p293_p2 = scmp.lt.s32.totalorder %s2413_s29, 9 }
   0x5   : > { %s3040_s30 = smov (%p29_p1, %s28_s30), 0  ;;  %p294_p3 = pnand %p1935_p0, %p293_p2 }
   0x6   : > { %p358_p4 = scmp.lt.s32.totalorder (!%p294_p3), %s2405_s27, 7  ;;  %p1944_p5 = scmp.ne.s32.totalorder (!%p294_p3), %s2405_s27, 0 }
   0x7   : > { %297 = sbr.rel (%p294_p3) target bundleno = 663 (0x297), region = 44 }
   0xe   : > { %s359_s9 = scalar_select %p358_p4, %s2405_s27, 7 }
   0xf   : > { %405 = sbr.rel (%p1944_p5) target bundleno = 22 (0x16), region = 48  ;;  %v2415_v0 = vmov (!%p1944_p5), 0.0  }
  0x10   : > { %s2096_s10 = sshll.u32 %s359_s9, 5  ;;  %406 = vst [vmem:[#allocation2] sm:$0xff] (!%p1944_p5), %v2415_v0  ;;  %407 = vst [vmem:[#allocation2 + $0x8] sm:$0xff] (!%p1944_p5), %v2415_v0 }
  0x11   : > { %s2484_s13 = scalar_lea.vmem %s3020_s0, %s2096_s10  ;;  %s2489_s16 = scalar_lea.vmem %s3026_s6, %s2096_s10  ;;  %408 = vst [vmem:[#allocation2 + $0x10] sm:$0xff] (!%p1944_p5), %v2415_v0  ;;  %409 = vst [vmem:[#allocation2 + $0x18] sm:$0xff] (!%p1944_p5), %v2415_v0 }
  0x12   : > { %s2494_s19 = scalar_lea.vmem %s3027_s7, %s2096_s10  ;;  %s2499_s22 = scalar_lea.vmem %s3028_s8, %s2096_s10 }
  0x16 PF: > { %v2201_v1 = vld [vmem:[%s3021_s1 + $0x4] ss:$12 sps:$4 sm:$0xff]   ;;  %v2203_v2 = vld [vmem:[%s3021_s1] ss:$12 sps:$4 sm:$0xff]   ;;  %v2416_v3 = vmov 0   ;;  %vm729_vm0 = vcmask 523264   ;;  %v414_v51 = vlaneseq }
  0x17   : > { %789 = vmatprep.subr.bf16.mxu1 %v2416_v3  ;;  %736 = vmatprep.subr.bf16.mxu0 %v2201_v1  ;;  %v2204_v4 = vld [vmem:[%s3021_s1 + $0x1c] ss:$12 sps:$4 sm:$0xff]   ;;  %v2206_v5 = vld [vmem:[%s3021_s1 + $0x18] ss:$12 sps:$4 sm:$0xff]   ;;  %v2207_v6 = vld [vmem:[%s3021_s1 + $0x34] ss:$12 sps:$4 sm:$0xff]  }
  0x18   : > { %737 = vmatpush1.bf16.msra.mxu0 %v2203_v2  ;;  %v2209_v7 = vld [vmem:[%s3021_s1 + $0x30] ss:$12 sps:$4 sm:$0xff]   ;;  %v2210_v8 = vld [vmem:[%s3021_s1 + $0x4c] ss:$12 sps:$4 sm:$0xff]   ;;  %v2212_v9 = vld [vmem:[%s3021_s1 + $0x48] ss:$12 sps:$4 sm:$0xff]  }
  0x19   : > { %738 = vmatprep.subr.bf16.mxu0 %v2204_v4  ;;  %v2225_v10 = vld [vmem:[%s3021_s1 + $0x8] ss:$12 sps:$4 sm:$0xff]   ;;  %v2213_v11 = vld [vmem:[%s3021_s1 + $0x64] ss:$12 sps:$4 sm:$0xff]   ;;  %v2229_v12 = vld [vmem:[%s3021_s1 + $0x20] ss:$12 sps:$4 sm:$0xff]  }
  0x1a   : > { %790 = vmatpush1.bf16.msra.mxu1 %v2225_v10  ;;  %v2215_v13 = vld [vmem:[%s3021_s1 + $0x60] ss:$12 sps:$4 sm:$0xff]   ;;  %v2216_v14 = vld [vmem:[%s3021_s1 + $0x7c] ss:$12 sps:$4 sm:$0xff]   ;;  %v2233_v15 = vld [vmem:[%s3021_s1 + $0x38] ss:$12 sps:$4 sm:$0xff]  }
  0x1b   : > { %791 = vmatprep.subr.bf16.mxu1 %v2416_v3  ;;  %v2218_v16 = vld [vmem:[%s3021_s1 + $0x78] ss:$12 sps:$4 sm:$0xff]   ;;  %v2219_v17 = vld [vmem:[%s3021_s1 + $0x94] ss:$12 sps:$4 sm:$0xff]   ;;  %v2237_v18 = vld [vmem:[%s3021_s1 + $0x50] ss:$12 sps:$4 sm:$0xff]  }
  0x1c   : > { %739 = vmatpush1.bf16.msra.mxu0 %v2206_v5  ;;  %v2244_v19 = vld [vmem:[%s2484_s13 + $0x4] ss:$8 sps:$4 sm:$0xff]   ;;  %v2221_v20 = vld [vmem:[%s3021_s1 + $0x90] ss:$12 sps:$4 sm:$0xff]   ;;  %v2241_v22 = vld [vmem:[%s3021_s1 + $0x68] ss:$12 sps:$4 sm:$0xff]  }
  0x1d   : > { %740 = vmatprep.subr.bf16.mxu0 %v2207_v6  ;;  %v2222_v21 = vld [vmem:[%s3021_s1 + $0xac] ss:$12 sps:$4 sm:$0xff]   ;;  %1985 = vmatprep.mubr.msk.bf16.mxu0 %vm729_vm0, %v2244_v19  ;;  %v2224_v23 = vld [vmem:[%s3021_s1 + $0xa8] ss:$12 sps:$4 sm:$0xff]   ;;  %v2226_v24 = vld [vmem:[%s3021_s1 + $0xc4] ss:$12 sps:$4 sm:$0xff]  }
  0x1e   : > { %792 = vmatpush1.bf16.msra.mxu1 %v2229_v12  ;;  %1987 = vmatprep.mubr.msk.bf16.mxu1 %vm729_vm0, %v2244_v19  ;;  %v2248_v25 = vld [vmem:[%s3021_s1 + $0x80] ss:$12 sps:$4 sm:$0xff]   ;;  %v2230_v27 = vld [vmem:[%s3021_s1 + $0xdc] ss:$12 sps:$4 sm:$0xff]   ;;  %v2252_v28 = vld [vmem:[%s3021_s1 + $0x98] ss:$12 sps:$4 sm:$0xff]  }
  0x1f   : > { %793 = vmatprep.subr.bf16.mxu1 %v2416_v3  ;;  %v2228_v26 = vld [vmem:[%s3021_s1 + $0xc0] ss:$12 sps:$4 sm:$0xff]   ;;  %v2232_v29 = vld [vmem:[%s3021_s1 + $0xd8] ss:$12 sps:$4 sm:$0xff]   ;;  %v2256_v31 = vld [vmem:[%s3021_s1 + $0xb0] ss:$12 sps:$4 sm:$0xff]  }
  0x20   : > { %741 = vmatpush1.bf16.msra.mxu0 %v2209_v7  ;;  %v2234_v30 = vld [vmem:[%s3021_s1 + $0xf4] ss:$12 sps:$4 sm:$0xff]   ;;  %v2236_v32 = vld [vmem:[%s3021_s1 + $0xf0] ss:$12 sps:$4 sm:$0xff]   ;;  %v2238_v33 = vld [vmem:[%s3021_s1 + $0x10c] ss:$12 sps:$4 sm:$0xff]  }
  0x21   : > { %742 = vmatprep.subr.bf16.mxu0 %v2210_v8  ;;  %v2260_v34 = vld [vmem:[%s3021_s1 + $0xc8] ss:$12 sps:$4 sm:$0xff]   ;;  %v2247_v36 = vld [vmem:[%s3022_s2 + $0x4] ss:$8 sps:$4 sm:$0xff]   ;;  %v2249_v42 = vld [vmem:[%s3022_s2 + $0x10] ss:$8 sps:$4 sm:$0xff]  }
  0x22   : > { %794 = vmatpush1.bf16.msra.mxu1 %v2233_v15  ;;  %v2240_v35 = vld [vmem:[%s3021_s1 + $0x108] ss:$12 sps:$4 sm:$0xff]   ;;  %v2264_v37 = vld [vmem:[%s3021_s1 + $0xe0] ss:$12 sps:$4 sm:$0xff]   ;;  %v2268_v41 = vld [vmem:[%s3021_s1 + $0xf8] ss:$12 sps:$4 sm:$0xff]  }
  0x23   : > { %795 = vmatprep.subr.bf16.mxu1 %v2416_v3  ;;  %v2242_v38 = vld [vmem:[%s2484_s13] ss:$8 sps:$4 sm:$0xff]   ;;  %v2251_v40 = vld [vmem:[%s3022_s2 + $0x14] ss:$8 sps:$4 sm:$0xff]   ;;  %v2255_v43 = vld [vmem:[%s3022_s2 + $0x24] ss:$8 sps:$4 sm:$0xff]  }
  0x24   : > { %743 = vmatpush1.bf16.msra.mxu0 %v2212_v9  ;;  %v2245_v39 = vld [vmem:[%s3022_s2] ss:$8 sps:$4 sm:$0xff]   ;;  %v2272_v44 = vld [vmem:[%s3021_s1 + $0x110] ss:$12 sps:$4 sm:$0xff]   ;;  %v2278_v46 = vld [vmem:[%s3022_s2 + $0x104] ss:$8 sps:$4 sm:$0xff]  }
  0x25   : > { %744 = vmatprep.subr.bf16.mxu0 %v2213_v11  ;;  %v2253_v45 = vld [vmem:[%s3022_s2 + $0x20] ss:$8 sps:$4 sm:$0xff]   ;;  %v2309_v47 = vld [vmem:[%s2484_s13 + $0x14] ss:$8 sps:$4 sm:$0xff]   ;;  %v2257_v52 = vld [vmem:[%s3022_s2 + $0x30] ss:$8 sps:$4 sm:$0xff]  }
  0x26   : > { %796 = vmatpush1.bf16.msra.mxu1 %v2237_v18  ;;  %v2259_v48 = vld [vmem:[%s3022_s2 + $0x34] ss:$8 sps:$4 sm:$0xff]   ;;  %v2276_v49 = vld [vmem:[%s3022_s2 + $0x100] ss:$8 sps:$4 sm:$0xff]   ;;  %v2263_v53 = vld [vmem:[%s3022_s2 + $0x44] ss:$8 sps:$4 sm:$0xff]  }
  0x27   : > { %797 = vmatprep.subr.bf16.mxu1 %v2416_v3  ;;  %v2284_v50 = vld [vmem:[%s3022_s2 + $0x114] ss:$8 sps:$4 sm:$0xff]   ;;  %v2314_v54 = vld [vmem:[%s2484_s13 + $0x10] ss:$8 sps:$4 sm:$0xff]   ;;  %v2290_v56 = vld [vmem:[%s3022_s2 + $0x124] ss:$8 sps:$4 sm:$0xff]  }
  0x28   : > { %745 = vmatpush1.bf16.msra.mxu0 %v2215_v13  ;;  %v2282_v55 = vld [vmem:[%s3022_s2 + $0x110] ss:$8 sps:$4 sm:$0xff]   ;;  %v2671_v57 = vshrl.u32 %v414_v51, 7  ;;  %v2261_v58 = vld [vmem:[%s3022_s2 + $0x40] ss:$8 sps:$4 sm:$0xff]   ;;  %vm2417_vm3 = vmmov 1  }
  0x29   : > { %746 = vmatprep.subr.bf16.mxu0 %v2216_v14  ;;  %v2676_v59 = vld [vmem:[#allocation2] sm:$0xff]  ;;  %v2678_v60 = vld [vmem:[#allocation2 + $0x8] sm:$0xff]  ;;  %v2267_v61 = vld [vmem:[%s3022_s2 + $0x54] ss:$8 sps:$4 sm:$0xff]  }
  0x2a   : > { %798 = vmatpush1.bf16.msra.mxu1 %v2241_v22  ;;  %v873_v62 = vpack.c.bf16 %v2678_v60, %v2676_v59  ;;  %v2265_v63 = vld [vmem:[%s3022_s2 + $0x50] ss:$8 sps:$4 sm:$0xff]   ;;  %v2288_v0 = vld [vmem:[%s3022_s2 + $0x120] ss:$8 sps:$4 sm:$0xff]   ;;  %v2296_v1 = vld [vmem:[%s3022_s2 + $0x134] ss:$8 sps:$4 sm:$0xff]  }
  0x2b   : > { %799 = vmatprep.subr.bf16.mxu1 %v2416_v3  ;;  %v2271_v2 = vld [vmem:[%s3022_s2 + $0x64] ss:$8 sps:$4 sm:$0xff]   ;;  %v416_v4 = vadd.s32 8, %v2671_v57  ;;  %v855_v5 = vrot.slane %v2676_v59, 1  ;;  %v2294_v6 = vld [vmem:[%s3022_s2 + $0x130] ss:$8 sps:$4 sm:$0xff]  }
  0x2c   : > { %747 = vmatpush1.bf16.msra.mxu0 %v2218_v16  ;;  %v2302_v7 = vld [vmem:[%s3022_s2 + $0x144] ss:$8 sps:$4 sm:$0xff]   ;;  %v2269_v8 = vld [vmem:[%s3022_s2 + $0x60] ss:$8 sps:$4 sm:$0xff]   ;;  %v2275_v9 = vld [vmem:[%s3022_s2 + $0x74] ss:$8 sps:$4 sm:$0xff]  }
  0x2d   : > { %748 = vmatprep.subr.bf16.mxu0 %v2219_v17  ;;  %v2300_v10 = vld [vmem:[%s3022_s2 + $0x140] ss:$8 sps:$4 sm:$0xff]   ;;  %v2308_v11 = vld [vmem:[%s3022_s2 + $0x154] ss:$8 sps:$4 sm:$0xff]   ;;  %v2273_v12 = vld [vmem:[%s3022_s2 + $0x70] ss:$8 sps:$4 sm:$0xff]  }
  0x2e   : > { %800 = vmatpush1.bf16.msra.mxu1 %v2248_v25  ;;  %v2281_v13 = vld [vmem:[%s3022_s2 + $0x84] ss:$8 sps:$4 sm:$0xff]   ;;  %v2306_v14 = vld [vmem:[%s3022_s2 + $0x150] ss:$8 sps:$4 sm:$0xff]   ;;  %v2279_v17 = vld [vmem:[%s3022_s2 + $0x80] ss:$8 sps:$4 sm:$0xff]  }
  0x2f   : > { %801 = vmatprep.subr.bf16.mxu1 %v2416_v3  ;;  %v2317_v15 = vld [vmem:[%s3022_s2 + $0x164] ss:$8 sps:$4 sm:$0xff]   ;;  %v2730_v16 = vld [vmem:[#allocation2 + $0x10] sm:$0xff]  ;;  %v2315_v19 = vld [vmem:[%s3022_s2 + $0x160] ss:$8 sps:$4 sm:$0xff]   ;;  %vm859_vm1 = vcmp.lt.s32.totalorder %v2671_v57, 7 }
  0x30   : > { %749 = vmatpush1.bf16.msra.mxu0 %v2221_v20  ;;  %v2287_v18 = vld [vmem:[%s3022_s2 + $0x94] ss:$8 sps:$4 sm:$0xff]   ;;  %v856_v20 = vrot.slane %v2678_v60, 1  ;;  %v2293_v25 = vld [vmem:[%s3022_s2 + $0xa4] ss:$8 sps:$4 sm:$0xff]   ;;  %v423_v51 = vand.u32 15, %v2671_v57 }
  0x31   : > { %750 = vmatprep.subr.bf16.mxu0 %v2222_v21  ;;  %v857_v21 = vrot.slane %v2730_v16, 1  ;;  %v2323_v22 = vld [vmem:[%s3022_s2 + $0x174] ss:$8 sps:$4 sm:$0xff]   ;;  %vm842_vm7 = vcmp.lt.s32.totalorder %v2671_v57, 1 }
  0x32   : > { %802 = vmatpush1.bf16.msra.mxu1 %v2252_v28  ;;  %v862_v28 = vsel %vm859_vm1, %v855_v5, %v856_v20  ;;  %vm847_vm8 = vcmp.ge.s32.totalorder %v423_v51, 1 }
  0x33   : > { %803 = vmatprep.subr.bf16.mxu1 %v2416_v3  ;;  %vm2831_vm9 = vmpackc.low %vm2417_vm3, %vm847_vm8 }
  0x34   : > { %751 = vmatpush1.bf16.msra.mxu0 %v2224_v23  ;;  %v430_v23 = vand.u32 15, %v416_v4  ;;  %v2349_v4 = vld [vmem:[%s3023_s3 + $0xb0] sm:$0xff]  }
  0x35   : > { %752 = vmatprep.subr.bf16.mxu0 %v2226_v24  ;;  %v2285_v24 = vld [vmem:[%s3022_s2 + $0x90] ss:$8 sps:$4 sm:$0xff]  }
  0x36   : > { %804 = vmatpush1.bf16.msra.mxu1 %v2256_v31  ;;  %vm865_vm2 = vcmp.lt.s32.totalorder %v430_v23, 15  ;;  %v2299_v31 = vld [vmem:[%s3022_s2 + $0xb4] ss:$8 sps:$4 sm:$0xff]  }
  0x37   : > { %805 = vmatprep.subr.bf16.mxu1 %v2416_v3  ;;  %vm2772_vm4 = vmpackc.low %vm865_vm2, %vm2417_vm3 }
  0x38   : > { %753 = vmatpush1.bf16.msra.mxu0 %v2228_v26  ;;  %v2321_v26 = vld [vmem:[%s3022_s2 + $0x170] ss:$8 sps:$4 sm:$0xff]  }
  0x39   : > { %754 = vmatprep.subr.bf16.mxu0 %v2230_v27  ;;  %v861_v27 = vsel %vm859_vm1, %v856_v20, %v857_v21  ;;  %v2341_v20 = vld [vmem:[%s3023_s3 + $0x78] sm:$0xff]  }
  0x3a   : > { %806 = vmatpush1.bf16.msra.mxu1 %v2260_v34  ;;  %v2350_v34 = vld [vmem:[%s3023_s3 + $0xb8] sm:$0xff]  }
  0x3b   : > { %807 = vmatprep.subr.bf16.mxu1 %v2416_v3 }
  0x3c   : > { %755 = vmatpush1.bf16.msra.mxu0 %v2232_v29  ;;  %v418_v29 = vadd.s32 24, %v2671_v57 }
  0x3d   : > { %756 = vmatprep.subr.bf16.mxu0 %v2234_v30  ;;  %v2291_v30 = vld [vmem:[%s3022_s2 + $0xa0] ss:$8 sps:$4 sm:$0xff]  }
  0x3e   : > { %808 = vmatpush1.bf16.msra.mxu1 %v2264_v37  ;;  %v2297_v37 = vld [vmem:[%s3022_s2 + $0xb0] ss:$8 sps:$4 sm:$0xff]  }
  0x3f   : > { %809 = vmatprep.subr.bf16.mxu1 %v2416_v3 }
  0x40   : > { %757 = vmatpush1.bf16.msra.mxu0 %v2236_v32  ;;  %v2044_v32 = vpack.c.bf16 %v861_v27, %v862_v28 }
  0x41   : > { %758 = vmatprep.subr.bf16.mxu0 %v2238_v33  ;;  %v2769_v33 = vld [vmem:[#allocation2 + $0x18] sm:$0xff] }
  0x42   : > { %810 = vmatpush1.bf16.msra.mxu1 %v2268_v41  ;;  %v2303_v41 = vld [vmem:[%s3022_s2 + $0xc0] ss:$8 sps:$4 sm:$0xff]  }
  0x43   : > { %811 = vmatprep.subr.bf16.mxu1 %v2416_v3 }
  0x44   : > { %759 = vmatpush1.bf16.msra.mxu0 %v2240_v35  ;;  %v858_v35 = vrot.slane %v2769_v33, 1 }
  0x45   : > { %1166 = vmatprep.subr.bf16.mxu0 %v2247_v36  ;;  %v444_v36 = vand.u32 15, %v418_v29 }
  0x46   : > { %812 = vmatpush1.bf16.msra.mxu1 %v2272_v44  ;;  %v2311_v44 = vld [vmem:[%s3022_s2 + $0xd0] ss:$8 sps:$4 sm:$0xff]  }
  0x47   : > { %769 = vmatmul.mubr.bf16.vlgmr.msra.gmra.mrb[0].mxu0 %v2242_v38  ;;  %1219 = vmatprep.subr.bf16.mxu1 %v2278_v46  ;;  %vm867_vm5 = vcmp.lt.s32.totalorder %v444_v36, 15  ;;  %v2318_v46 = vld [vmem:[%s3022_s2 + $0xe0] ss:$8 sps:$4 sm:$0xff]  }
  0x48   : > { %1167 = vmatpush1.bf16.msra.mxu0 %v2245_v39  ;;  %1986 = vmatprep.mubr.msk.bf16.mxu0 %vm729_vm0, %v2309_v47  ;;  %v860_v39 = vsel %vm859_vm1, %v857_v21, %v858_v35  ;;  %vm2799_vm6 = vmpackc.low %vm867_vm5, %vm2417_vm3  ;;  %v2342_v21 = vld [vmem:[%s3023_s3 + $0x38] sm:$0xff]  }
  0x49   : > { %1168 = vmatprep.subr.bf16.mxu0 %v2251_v40  ;;  %822 = vmatmul.mubr.bf16.vlgmr.msra.gmra.mrb[0].mxu1 %v2242_v38  ;;  %v2305_v38 = vld [vmem:[%s3022_s2 + $0xc4] ss:$8 sps:$4 sm:$0xff]   ;;  %v863_v40 = vsel %vm859_vm1, %v858_v35, %v855_v5 }
  0x4a   : > { %1220 = vmatpush1.bf16.msra.mxu1 %v2276_v49  ;;  %1988 = vmatprep.mubr.msk.bf16.mxu1 %vm729_vm0, %v2309_v47  ;;  %v838_v47 = vrot.slane %v2676_v59, 7  ;;  %v841_v49 = vrot.slane %v2769_v33, 7  ;;  %v2327_v5 = vld [vmem:[%s3023_s3 + $0x40] sm:$0xff]  }
  0x4b   : > { %1221 = vmatprep.subr.bf16.mxu1 %v2284_v50  ;;  %v2326_v50 = vld [vmem:[%s3022_s2 + $0xf4] ss:$8 sps:$4 sm:$0xff]  }
  0x4c   : > { %1169 = vmatpush1.bf16.msra.mxu0 %v2249_v42  ;;  %v2313_v42 = vld [vmem:[%s3022_s2 + $0xd4] ss:$8 sps:$4 sm:$0xff]  }
  0x4d   : > { %1170 = vmatprep.subr.bf16.mxu0 %v2255_v43  ;;  %v2093_v43 = vld [vmem:[%s3025_s5] ss:$0 sm:$0xff] }
  0x4e   : > { %1222 = vmatpush1.bf16.msra.mxu1 %v2282_v55  ;;  %v417_v55 = vadd.s32 16, %v2671_v57 }
  0x4f   : > { %779 = vmatmul.mubr.bf16.gmra.mrb[4].mxu0 %v2314_v54  ;;  %1223 = vmatprep.subr.bf16.mxu1 %v2290_v56 }
  0x50   : > { %1171 = vmatpush1.bf16.msra.mxu0 %v2253_v45  ;;  %1198 = vmatprep.mubr.bf16.mxu0 %v873_v62  ;;  %v2320_v45 = vld [vmem:[%s3022_s2 + $0xe4] ss:$8 sps:$4 sm:$0xff]   ;;  %v840_v62 = vrot.slane %v2730_v16, 7 }
  0x51   : > { %1172 = vmatprep.subr.bf16.mxu0 %v2259_v48  ;;  %830 = vmatmul.mubr.bf16.gmra.mrb[4].mxu1 %v2314_v54  ;;  %v839_v48 = vrot.slane %v2678_v60, 7  ;;  %v846_v54 = vsel %vm842_vm7, %v841_v49, %v838_v47 }
  0x52   : > { %1224 = vmatpush1.bf16.msra.mxu1 %v2288_v0  ;;  %1251 = vmatprep.mubr.bf16.mxu1 %v2416_v3  ;;  %v843_v0 = vsel %vm842_vm7, %v840_v62, %v841_v49 }
  0x53   : > { %1225 = vmatprep.subr.bf16.mxu1 %v2296_v1  ;;  %v844_v1 = vsel %vm842_vm7, %v839_v48, %v840_v62 }
  0x54   : > { %1173 = vmatpush1.bf16.msra.mxu0 %v2257_v52  ;;  %v2324_v52 = vld [vmem:[%s3022_s2 + $0xf0] ss:$8 sps:$4 sm:$0xff]  }
  0x55   : > { %1174 = vmatprep.subr.bf16.mxu0 %v2263_v53  ;;  %v845_v53 = vsel %vm842_vm7, %v838_v47, %v839_v48 }
  0x56   : > { %1226 = vmatpush1.bf16.msra.mxu1 %v2294_v6  ;;  %v2038_v56 = vpack.c.bf16 %v845_v53, %v846_v54  ;;  %v2328_v6 = vld [vmem:[%s3023_s3] sm:$0xff]  }
  0x57   : > { %1227 = vmatprep.subr.bf16.mxu1 %v2302_v7  ;;  %v2329_v7 = vld [vmem:[%s3023_s3 + $0x48] sm:$0xff]  }
  0x58   : > { %1175 = vmatpush1.bf16.msra.mxu0 %v2261_v58  ;;  %v2347_v58 = vld [vmem:[%s3023_s3 + $0xa0] sm:$0xff]  }
  0x59   : > { %1176 = vmatprep.subr.bf16.mxu0 %v2267_v61  ;;  %v876_v61 = vpack.c.bf16 %v2769_v33, %v2730_v16 }
  0x5a   : > { %1228 = vmatpush1.bf16.msra.mxu1 %v2300_v10  ;;  %v2332_v10 = vld [vmem:[%s3023_s3 + $0x10] sm:$0xff]  }
  0x5b   : > { %1229 = vmatprep.subr.bf16.mxu1 %v2308_v11  ;;  %v2333_v11 = vld [vmem:[%s3023_s3 + $0x58] sm:$0xff]  }
  0x5c   : > { %1177 = vmatpush1.bf16.msra.mxu0 %v2265_v63  ;;  %v437_v63 = vand.u32 15, %v417_v55 }
  0x5d   : > { %1178 = vmatprep.subr.bf16.mxu0 %v2271_v2  ;;  %v2041_v2 = vpack.c.bf16 %v843_v0, %v844_v1 }
  0x5e   : > { %1230 = vmatpush1.bf16.msra.mxu1 %v2306_v14  ;;  %vm849_vm10 = vcmp.ge.s32.totalorder %v437_v63, 1  ;;  %v2336_v14 = vld [vmem:[%s3023_s3 + $0x20] sm:$0xff]  }
  0x5f   : > { %1231 = vmatprep.subr.bf16.mxu1 %v2317_v15  ;;  %vm2845_vm11 = vmpackc.low %vm2417_vm3, %vm849_vm10  ;;  %v2337_v15 = vld [vmem:[%s3023_s3 + $0x68] sm:$0xff]  }
  0x60   : > { %1179 = vmatpush1.bf16.msra.mxu0 %v2269_v8  ;;  %v2330_v8 = vld [vmem:[%s3023_s3 + $0x8] sm:$0xff]  }
  0x61   : > { %1180 = vmatprep.subr.bf16.mxu0 %v2275_v9  ;;  %v2331_v9 = vld [vmem:[%s3023_s3 + $0x50] sm:$0xff]  }
  0x62   : > { %1232 = vmatpush1.bf16.msra.mxu1 %v2315_v19  ;;  %v2340_v19 = vld [vmem:[%s3023_s3 + $0x30] sm:$0xff]  }
  0x63   : > { %1233 = vmatprep.subr.bf16.mxu1 %v2323_v22  ;;  %v2902_v22 = vld [vmem:[%s3023_s3 + $0x80] sm:$0xff]  }
  0x64   : > { %1181 = vmatpush1.bf16.msra.mxu0 %v2273_v12  ;;  %v2334_v12 = vld [vmem:[%s3023_s3 + $0x18] sm:$0xff]  }
  0x65   : > { %1182 = vmatprep.subr.bf16.mxu0 %v2281_v13  ;;  %v2335_v13 = vld [vmem:[%s3023_s3 + $0x60] sm:$0xff]  }
  0x66   : > { %1234 = vmatpush1.bf16.msra.mxu1 %v2321_v26 }
  0x67   : > { %2100 = vmatprep.subr.bf16.mxu1 %v2327_v5 }
  0x68   : > { %1183 = vmatpush1.bf16.msra.mxu0 %v2279_v17  ;;  %v2338_v17 = vld [vmem:[%s3023_s3 + $0x28] sm:$0xff]  }
  0x69   : > { %1184 = vmatprep.subr.bf16.mxu0 %v2287_v18  ;;  %2045 = vmatmul.mubr.msk.bf16.vlgmr.msra.gmra.mrb[8].mxu1 %vm2772_vm4, %v2044_v32  ;;  %v2339_v18 = vld [vmem:[%s3023_s3 + $0x70] sm:$0xff]  }
  0x6a   : > { %1261 = vmatprep.mubr.bf16.mxu1 %v2416_v3  ;;  %v2047_v3 = vpack.c.bf16 %v863_v40, %v860_v39  ;;  %2101 = vmatpush3.bf16.msra.mxu1 %v2328_v6 }
  0x6b   : > { %2102 = vmatprep.subr.bf16.mxu1 %v2329_v7 }
  0x6c   : > { %1185 = vmatpush1.bf16.msra.mxu0 %v2285_v24 }
  0x6d   : > { %1186 = vmatprep.subr.bf16.mxu0 %v2293_v25 }
  0x6e   : > { %2103 = vmatpush3.bf16.msra.mxu1 %v2330_v8 }
  0x6f   : > { %2104 = vmatprep.subr.bf16.mxu1 %v2331_v9 }
  0x70   : > { %1187 = vmatpush1.bf16.msra.mxu0 %v2291_v30 }
  0x71   : > { %1188 = vmatprep.subr.bf16.mxu0 %v2299_v31  ;;  %2048 = vmatmul.mubr.msk.bf16.gmra.mrb[12].mxu1 %vm2799_vm6, %v2047_v3  ;;  %v1288_v3 = vsub.s32 1, %v2671_v57 }
  0x72   : > { %2105 = vmatpush3.bf16.msra.mxu1 %v2332_v10 }
  0x73   : > { %2106 = vmatprep.subr.bf16.mxu1 %v2333_v11 }
  0x74   : > { %1189 = vmatpush1.bf16.msra.mxu0 %v2297_v37 }
  0x75   : > { %1190 = vmatprep.subr.bf16.mxu0 %v2305_v38 }
  0x76   : > { %2107 = vmatpush3.bf16.msra.mxu1 %v2334_v12 }
  0x77   : > { %2108 = vmatprep.subr.bf16.mxu1 %v2335_v13 }
  0x78   : > { %1191 = vmatpush1.bf16.msra.mxu0 %v2303_v41  ;;  %v1284_v41 = vsub.s32 0, %v2671_v57  ;;  %v2345_v57 = vld [vmem:[%s3023_s3 + $0x90] sm:$0xff]  }
  0x79   : > { %1192 = vmatprep.subr.bf16.mxu0 %v2313_v42  ;;  %v1280_v42 = vld [vmem:[%s3024_s4] sm:$0x3] }
  0x7a   : > { %2109 = vmatpush3.bf16.msra.mxu1 %v2336_v14 }
  0x7b   : > { %2110 = vmatprep.subr.bf16.mxu1 %v2337_v15 }
  0x7c   : > { %1193 = vmatpush1.bf16.msra.mxu0 %v2311_v44  ;;  %v1285_v44 = vrot.slane %v1280_v42, %v1284_v41 }
  0x7d   : > { %1194 = vmatprep.subr.bf16.mxu0 %v2320_v45 }
  0x7e   : > { %2111 = vmatpush3.bf16.msra.mxu1 %v2338_v17 }
  0x7f   : > { %2112 = vmatprep.subr.bf16.mxu1 %v2339_v18 }
  0x80   : > { %1195 = vmatpush1.bf16.msra.mxu0 %v2318_v46  ;;  %v1289_v46 = vrot.slane %v1280_v42, %v1288_v3 }
  0x81   : > { %1196 = vmatprep.subr.bf16.mxu0 %v2326_v50 }
  0x82   : > { %2113 = vmatpush3.bf16.msra.mxu1 %v2340_v19 }
  0x83   : > { %2114 = vmatprep.subr.bf16.mxu1 %v2341_v20 }
  0x84   : > { %1197 = vmatpush1.bf16.msra.mxu0 %v2324_v52 }
  0x86   : > { %2115 = vmatpush3.bf16.msra.mxu1 %v2342_v21 }
  0x87   : > { %2039 = vmatmul.mubr.msk.bf16.vlgmr.msra.gmra.mrb[0].mxu0 %vm2831_vm9, %v2038_v56  ;;  %2138 = vmatprep.subr.bf16.mxu1 %v2902_v22 }
  0x88   : > { %1208 = vmatprep.mubr.bf16.mxu0 %v876_v61 }
  0x8f   : > { %2042 = vmatmul.mubr.msk.bf16.gmra.mrb[4].mxu0 %vm2845_vm11, %v2041_v2 }
 0x11c   : > { %v2905_v23 = vpop.f32.mrb[0].mxu1 }
 0x11d   : > { %v825_v24 = vpop.f32.mrb[1].mxu1 }
 0x11e   : > { %v2907_v25 = vpop.f32.mrb[2].mxu1 }
 0x11f   : > { %v828_v26 = vpop.f32.mrb[3].mxu1 }
 0x124   : > { %v2909_v27 = vpop.f32.mrb[4].mxu1 }
 0x125   : > { %v833_v28 = vpop.f32.mrb[5].mxu1 }
 0x126   : > { %v2911_v29 = vpop.f32.mrb[6].mxu1 }
 0x127   : > { %v836_v30 = vpop.f32.mrb[7].mxu1 }
 0x13c   : > { %v1253_v31 = vpop.f32.mrb[8].mxu1 }
 0x13d   : > { %v1255_v32 = vpop.f32.mrb[9].mxu1 }
 0x13e   : > { %v1257_v35 = vpop.f32.mrb[10].mxu1 }
 0x13f   : > { %v1259_v36 = vpop.f32.mrb[11].mxu1 }
 0x144   : > { %v1263_v37 = vpop.f32.mrb[12].mxu1 }
 0x145   : > { %v1265_v38 = vpop.f32.mrb[13].mxu1 }
 0x146   : > { %v1267_v39 = vpop.f32.mrb[14].mxu1 }
 0x147   : > { %v1269_v40 = vpop.f32.mrb[15].mxu1 }
 0x15a   : > { %v1200_v45 = vpop.f32.mrb[0].mxu0 }
 0x15b   : > { %v1254_v47 = vadd.f32 %v1253_v31, %v1200_v45  ;;  %v1202_v48 = vpop.f32.mrb[1].mxu0 }
 0x15c   : > { %v1256_v49 = vadd.f32 %v1255_v32, %v1202_v48  ;;  %v1204_v50 = vpop.f32.mrb[2].mxu0 }
 0x15d   : > { %v1292_v51 = vadd.f32 %v1285_v44, %v1254_v47  ;;  %v1258_v52 = vadd.f32 %v1257_v35, %v1204_v50  ;;  %v1206_v53 = vpop.f32.mrb[3].mxu0 }
 0x15e   : > { %v1293_v54 = vadd.f32 %v1289_v46, %v1256_v49  ;;  %v1260_v55 = vadd.f32 %v1259_v36, %v1206_v53 }
 0x15f   : > { %v2049_v56 = vmul.f32 -1.442695, %v1292_v51  ;;  %v1294_v61 = vadd.f32 %v1285_v44, %v1258_v52 }
 0x160   : > { %v2053_v62 = vmul.f32 -1.442695, %v1293_v54  ;;  %v1295_v63 = vadd.f32 %v1289_v46, %v1260_v55 }
 0x161   : > { %2351 = vpow2.f32 %v2049_v56  ;;  %v2050_v0 = vmul.f32 -1.442695, %v1294_v61 }
 0x162   : > { %2353 = vpow2.f32 %v2053_v62  ;;  %v2054_v1 = vmul.f32 -1.442695, %v1295_v63  ;;  %v1210_v2 = vpop.f32.mrb[4].mxu0 }
 0x163   : > { %2355 = vpow2.f32 %v2050_v0  ;;  %v1264_v5 = vadd.f32 %v1263_v37, %v1210_v2  ;;  %v1212_v6 = vpop.f32.mrb[5].mxu0 }
 0x164   : > { %2357 = vpow2.f32 %v2054_v1  ;;  %v1266_v7 = vadd.f32 %v1265_v38, %v1212_v6  ;;  %v1214_v8 = vpop.f32.mrb[6].mxu0 }
 0x165   : > { %v1296_v9 = vadd.f32 %v1285_v44, %v1264_v5  ;;  %v1268_v10 = vadd.f32 %v1267_v39, %v1214_v8  ;;  %v1216_v11 = vpop.f32.mrb[7].mxu0 }
 0x166   : > { %v1297_v12 = vadd.f32 %v1289_v46, %v1266_v7  ;;  %v1270_v13 = vadd.f32 %v1269_v40, %v1216_v11 }
 0x167   : > { %v2051_v14 = vmul.f32 -1.442695, %v1296_v9  ;;  %v1298_v15 = vadd.f32 %v1285_v44, %v1268_v10 }
 0x168   : > { %v2055_v17 = vmul.f32 -1.442695, %v1297_v12  ;;  %v1299_v18 = vadd.f32 %v1289_v46, %v1270_v13 }
 0x169   : > { %2359 = vpow2.f32 %v2051_v14  ;;  %v2052_v19 = vmul.f32 -1.442695, %v1298_v15 }
 0x16a   : > { %2361 = vpow2.f32 %v2055_v17  ;;  %v2056_v20 = vmul.f32 -1.442695, %v1299_v18  ;;  %v2344_v18 = vld [vmem:[%s3023_s3 + $0x88] sm:$0xff]  }
 0x16b   : > { %v2352_v21 = vpop.eup %2351  ;;  %2363 = vpow2.f32 %v2052_v19 }
 0x16c   : > { %v2354_v24 = vpop.eup %2353  ;;  %v1312_v26 = vadd.f32 1.0, %v2352_v21  ;;  %2365 = vpow2.f32 %v2056_v20 }
 0x16d   : > { %v2356_v28 = vpop.eup %2355  ;;  %v1336_v30 = vadd.f32 1.0, %v2354_v24  ;;  %v2346_v24 = vld [vmem:[%s3023_s3 + $0x98] sm:$0xff]  }
 0x16e   : > { %v2358_v31 = vpop.eup %2357  ;;  %2367 = vrcp.f32 %v1312_v26  ;;  %v1313_v32 = vadd.f32 1.0, %v2356_v28 }
 0x16f   : > { %2369 = vrcp.f32 %v1336_v30  ;;  %v1337_v35 = vadd.f32 1.0, %v2358_v31 }
 0x170   : > { %2371 = vrcp.f32 %v1313_v32 }
 0x171   : > { %2373 = vrcp.f32 %v1337_v35 }
 0x173   : > { %v2360_v36 = vpop.eup %2359 }
 0x174   : > { %v2362_v37 = vpop.eup %2361  ;;  %v1314_v38 = vadd.f32 1.0, %v2360_v36 }
 0x175   : > { %v2364_v39 = vpop.eup %2363  ;;  %v1338_v40 = vadd.f32 1.0, %v2362_v37 }
 0x176   : > { %v2366_v41 = vpop.eup %2365  ;;  %2375 = vrcp.f32 %v1314_v38  ;;  %v1315_v42 = vadd.f32 1.0, %v2364_v39 }
 0x177   : > { %2377 = vrcp.f32 %v1338_v40  ;;  %v1339_v3 = vadd.f32 1.0, %v2366_v41 }
 0x178   : > { %v2368_v44 = vpop.eup %2367  ;;  %2379 = vrcp.f32 %v1315_v42 }
 0x179   : > { %v2918_v45 = vpop.eup %2369  ;;  %1715 = vst [vmem:[%s2494_s19] sm:$0xff] %v2368_v44  ;;  %2381 = vrcp.f32 %v1339_v3  ;;  %v1348_v46 = vmul.f32 %v2368_v44, %v2676_v59 }
 0x17a   : > { %v2372_v47 = vpop.eup %2371  ;;  %1719 = vst [vmem:[%s2499_s22] sm:$0xff] %v2918_v45 }
 0x17b   : > { %v2924_v48 = vpop.eup %2373  ;;  %1716 = vst [vmem:[%s2494_s19 + $0x8] sm:$0xff] %v2372_v47  ;;  %v1349_v49 = vmul.f32 %v2372_v47, %v2678_v60  ;;  %v1352_v50 = vrot.slane %v1348_v46, 7  ;;  %v1364_v53 = vrot.slane %v1348_v46, 1 }
 0x17c   : > { %1720 = vst [vmem:[%s2499_s22 + $0x8] sm:$0xff] %v2924_v48 }
 0x17d   : > { %v1353_v51 = vrot.slane %v1349_v49, 7  ;;  %v1377_v52 = vpack.c.bf16 %v1349_v49, %v1348_v46  ;;  %v1365_v54 = vrot.slane %v1349_v49, 1 }
 0x17f   : > { %v1358_v55 = vsel %vm842_vm7, %v1352_v50, %v1353_v51  ;;  %1606 = vmatprep.mubr.bf16.mxu1 %v1377_v52  ;;  %v1370_v56 = vsel %vm859_vm1, %v1364_v53, %v1365_v54 }
 0x180   : > { %v2376_v61 = vpop.eup %2375 }
 0x181   : > { %v2934_v62 = vpop.eup %2377  ;;  %1717 = vst [vmem:[%s2494_s19 + $0x10] sm:$0xff] %v2376_v61  ;;  %v1350_v63 = vmul.f32 %v2376_v61, %v2730_v16 }
 0x182   : > { %v2380_v0 = vpop.eup %2379  ;;  %1721 = vst [vmem:[%s2499_s22 + $0x10] sm:$0xff] %v2934_v62 }
 0x183   : > { %v2940_v1 = vpop.eup %2381  ;;  %v1351_v2 = vmul.f32 %v2380_v0, %v2769_v33  ;;  %1718 = vst [vmem:[%s2494_s19 + $0x18] sm:$0xff] %v2380_v0  ;;  %v1354_v5 = vrot.slane %v1350_v63, 7  ;;  %v1366_v6 = vrot.slane %v1350_v63, 1 }
 0x184   : > { %1722 = vst [vmem:[%s2499_s22 + $0x18] sm:$0xff] %v2940_v1 }
 0x185   : > { %v1355_v7 = vrot.slane %v1351_v2, 7  ;;  %v1380_v8 = vpack.c.bf16 %v1351_v2, %v1350_v63  ;;  %v1357_v9 = vsel %vm842_vm7, %v1353_v51, %v1354_v5  ;;  %v1367_v10 = vrot.slane %v1351_v2, 1 }
 0x186   : > { %v1369_v11 = vsel %vm859_vm1, %v1365_v54, %v1366_v6  ;;  %v1693_v2 = vsub.f32 1.0, %v2934_v62 }
 0x187   : > { %v1359_v12 = vsel %vm842_vm7, %v1355_v7, %v1352_v50  ;;  %v1356_v13 = vsel %vm842_vm7, %v1354_v5, %v1355_v7  ;;  %v1368_v14 = vsel %vm859_vm1, %v1366_v6, %v1367_v10  ;;  %v1371_v15 = vsel %vm859_vm1, %v1367_v10, %v1364_v53 }
 0x188   : > { %v2082_v17 = vpack.c.bf16 %v1358_v55, %v1359_v12  ;;  %v2085_v19 = vpack.c.bf16 %v1356_v13, %v1357_v9  ;;  %v2088_v20 = vpack.c.bf16 %v1369_v11, %v1370_v56  ;;  %v2091_v21 = vpack.c.bf16 %v1371_v15, %v1368_v14 }
 0x189   : > { %v1694_v5 = vsub.f32 1.0, %v2940_v1  ;;  %v1692_v6 = vsub.f32 1.0, %v2924_v48  ;;  %v1697_v7 = vmul.f32 %v1693_v2, %v2730_v16 }
 0x18a   : > { %2083 = vmatmul.mubr.msk.bf16.vlgmr.msra.gmra.mrb[16].mxu1 %vm2831_vm9, %v2082_v17 }
 0x18b   : > { %2139 = vmatpush3.bf16.msra.mxu1 %v2902_v22  ;;  %1614 = vmatprep.mubr.bf16.mxu1 %v1380_v8  ;;  %v2348_v22 = vld [vmem:[%s3023_s3 + $0xa8] sm:$0xff]   ;;  %v1698_v13 = vmul.f32 %v1694_v5, %v2769_v33  ;;  %v1696_v17 = vmul.f32 %v1692_v6, %v2678_v60 }
 0x18c   : > { %2140 = vmatprep.subr.bf16.mxu1 %v2344_v18 }
 0x18f   : > { %2141 = vmatpush3.bf16.msra.mxu1 %v2344_v18 }
 0x190   : > { %2142 = vmatprep.subr.bf16.mxu1 %v2345_v57 }
 0x192   : > { %2086 = vmatmul.mubr.msk.bf16.gmra.mrb[20].mxu1 %vm2845_vm11, %v2085_v19 }
 0x193   : > { %2143 = vmatpush3.bf16.msra.mxu1 %v2345_v57  ;;  %2154 = vmatprep.mubr.msk.bf16.mxu1 %vm2772_vm4, %v2088_v20 }
 0x194   : > { %2144 = vmatprep.subr.bf16.mxu1 %v2346_v24 }
 0x197   : > { %2145 = vmatpush3.bf16.msra.mxu1 %v2346_v24 }
 0x198   : > { %2146 = vmatprep.subr.bf16.mxu1 %v2347_v58 }
 0x19b   : > { %2147 = vmatpush3.bf16.msra.mxu1 %v2347_v58 }
 0x19c   : > { %2148 = vmatprep.subr.bf16.mxu1 %v2348_v22 }
 0x19f   : > { %2149 = vmatpush3.bf16.msra.mxu1 %v2348_v22 }
 0x1a0   : > { %2150 = vmatprep.subr.bf16.mxu1 %v2349_v4 }
 0x1a3   : > { %2151 = vmatpush3.bf16.msra.mxu1 %v2349_v4 }
 0x1a4   : > { %2152 = vmatprep.subr.bf16.mxu1 %v2350_v34 }
 0x1a7   : > { %2153 = vmatpush3.bf16.msra.mxu1 %v2350_v34 }
 0x1aa   : > { %2155 = vmatmul.mubr.msk.bf16.vlgmr.msra.gmra.mrb[24].mxu1 %vm2799_vm6, %v2091_v21 }
 0x25d   : > { %v2116_v26 = vpop.f32.mrb[16].mxu1 }
 0x25e   : > { %v2117_v28 = vpop.f32.mrb[17].mxu1 }
 0x25f   : > { %v2118_v30 = vadd.f32 %v2117_v28, %v2116_v26  ;;  %v2119_v31 = vpop.f32.mrb[18].mxu1 }
 0x260   : > { %v2120_v32 = vpop.f32.mrb[19].mxu1 }
 0x261   : > { %v2121_v35 = vadd.f32 %v2120_v32, %v2119_v31 }
 0x265   : > { %v2122_v36 = vpop.f32.mrb[20].mxu1 }
 0x266   : > { %v2123_v37 = vpop.f32.mrb[21].mxu1 }
 0x267   : > { %v2124_v38 = vadd.f32 %v2123_v37, %v2122_v36  ;;  %v2125_v39 = vpop.f32.mrb[22].mxu1 }
 0x268   : > { %v2126_v40 = vpop.f32.mrb[23].mxu1 }
 0x269   : > { %v2127_v41 = vadd.f32 %v2126_v40, %v2125_v39 }
 0x27d   : > { %v2156_v42 = vpop.f32.mrb[24].mxu1 }
 0x27e   : > { %v1666_v3 = vadd.f32 %v2156_v42, %v2124_v38  ;;  %v1657_v44 = vpop.f32.mrb[25].mxu1 }
 0x27f   : > { %v1658_v46 = vadd.f32 %v2118_v30, %v1657_v44  ;;  %v2157_v47 = vpop.f32.mrb[26].mxu1 }
 0x280   : > { %v1674_v49 = vadd.f32 %v1666_v3, %v2909_v27  ;;  %v1669_v50 = vadd.f32 %v2157_v47, %v2127_v41  ;;  %v1660_v51 = vpop.f32.mrb[27].mxu1  ;;  %v1691_v27 = vsub.f32 1.0, %v2918_v45 }
 0x281   : > { %v1672_v52 = vadd.f32 %v1658_v46, %v2905_v23  ;;  %v1661_v53 = vadd.f32 %v2121_v35, %v1660_v51 }
 0x282   : > { %v1685_v54 = vadd.f32 %v2093_v43, %v1674_v49  ;;  %v1675_v55 = vadd.f32 %v1669_v50, %v2911_v29  ;;  %v1695_v9 = vmul.f32 %v1691_v27, %v2676_v59 }
 0x283   : > { %v1683_v56 = vadd.f32 %v2093_v43, %v1672_v52  ;;  %v1673_v61 = vadd.f32 %v1661_v53, %v2907_v25 }
 0x284   : > { %2383 = vtanh.f32 %v1685_v54  ;;  %v1686_v63 = vadd.f32 %v2093_v43, %v1675_v55 }
 0x285   : > { %2385 = vtanh.f32 %v1683_v56  ;;  %v1684_v0 = vadd.f32 %v2093_v43, %v1673_v61 }
 0x286   : > { %2387 = vtanh.f32 %v1686_v63 }
 0x287   : > { %2389 = vtanh.f32 %v1684_v0 }
 0x28e   : > { %v2384_v23 = vpop.eup %2383 }
 0x28f   : > { %v2386_v29 = vpop.eup %2385  ;;  %v1701_v25 = vmul.f32 %v2384_v23, %v2934_v62 }
 0x290   : > { %v2388_v8 = vpop.eup %2387  ;;  %v1699_v10 = vmul.f32 %v2386_v29, %v2918_v45 }
 0x291   : > { %v2390_v11 = vpop.eup %2389  ;;  %v1705_v12 = vadd.f32 %v1701_v25, %v1697_v7  ;;  %v1702_v14 = vmul.f32 %v2388_v8, %v2940_v1 }
 0x292   : > { %v1703_v15 = vadd.f32 %v1699_v10, %v1695_v9  ;;  %v1700_v16 = vmul.f32 %v2390_v11, %v2924_v48 }
 0x293   : > { %1709 = vst [vmem:[#allocation2 + $0x10] sm:$0xff] %v1705_v12  ;;  %1713 = vst [vmem:[%s2489_s16 + $0x10] sm:$0xff] %v1705_v12  ;;  %v1706_v62 = vadd.f32 %v1702_v14, %v1698_v13 }
 0x294   : > { %1707 = vst [vmem:[#allocation2] sm:$0xff] %v1703_v15  ;;  %1711 = vst [vmem:[%s2489_s16] sm:$0xff] %v1703_v15  ;;  %v1704_v59 = vadd.f32 %v1700_v16, %v1696_v17 }
 0x295   : > { %1710 = vst [vmem:[#allocation2 + $0x18] sm:$0xff] %v1706_v62  ;;  %1714 = vst [vmem:[%s2489_s16 + $0x18] sm:$0xff] %v1706_v62 }
 0x296   : > { %1708 = vst [vmem:[#allocation2 + $0x8] sm:$0xff] %v1704_v59  ;;  %1712 = vst [vmem:[%s2489_s16 + $0x8] sm:$0xff] %v1704_v59 }
 0x297 PF: > { %s19_s29 = sadd.s32 1, %s2413_s29   ;;  %s3037_s27 = smov %s2409_s28 }
 0x298   : > { %p16_p6 = scmp.ge.s32.totalorder %s19_s29, 10   ;;  %s3038_s28 = smov %s3040_s30 }
 0x29a   :  { %18 = sbr.rel (!%p16_p6) target bundleno = 2 (0x2), region = 102 }

// kernel: _lambda_.3
= control target key start
LH: loop header
LB: loop body
LE: loop exit
PB: predicated region body
PF: predicated region fallthrough
CT: control target
= control target key end

     0   :  { %s2979_s27 = smov 0   ;;  %s2981_s28 = smov 0   ;;  %s3646_s0 = inlined_call_operand.vmem [shape: bf16[8,2,16,384], index: 0, kind: input, shape index: {}]   ;;  %s3647_s1 = inlined_call_operand.vmem [shape: bf16[384,384], index: 1, kind: input, shape index: {}]   ;;  %s3648_s2 = inlined_call_operand.vmem [shape: bf16[384,256], index: 2, kind: input, shape index: {}]   ;;  %s3649_s3 = inlined_call_operand.vmem [shape: bf16[384,128], index: 3, kind: input, shape index: {}]   ;;  %s3650_s4 = inlined_call_operand.vmem [shape: f32[1,256], index: 4, kind: input, shape index: {}]   ;;  %s3651_s5 = inlined_call_operand.vmem [shape: f32[1,128], index: 5, kind: input, shape index: {}]   ;;  %s3652_s6 = inlined_call_operand.vmem [shape: f32[8,2,16,128], index: 6, kind: output, shape index: {0}]   ;;  %s3653_s7 = inlined_call_operand.vmem [shape: f32[8,2,16,128], index: 7, kind: output, shape index: {1}]   ;;  %s3654_s8 = inlined_call_operand.vmem [shape: f32[8,2,16,128], index: 8, kind: output, shape index: {2}]  }
   0x1   :  { %s2983_s29 = smov 0  }
   0x2 LB: > { %s28_s30 = sadd.s32 1, %s2925_s28  ;;  %p2288_p0 = scmp.ge.s32.totalorder %s2929_s29, 1  ;;  %s2929_s29 = sphi %s2983_s29, %s19_s29   ;;  %s2925_s28 = sphi %s2981_s28, %s3664_s28   ;;  %s2921_s27 = sphi %s2979_s27, %s3663_s27  }
   0x3   : > { %p29_p1 = scmp.ge.s32.totalorder %s28_s30, 8  ;;  %p293_p2 = scmp.lt.s32.totalorder %s2929_s29, 9 }
   0x5   : > { %s3666_s30 = smov (%p29_p1, %s28_s30), 0  ;;  %p294_p3 = pnand %p2288_p0, %p293_p2 }
   0x6   : > { %p358_p4 = scmp.lt.s32.totalorder (!%p294_p3), %s2921_s27, 7  ;;  %p2296_p5 = scmp.ne.s32.totalorder (!%p294_p3), %s2921_s27, 0 }
   0x7   : > { %297 = sbr.rel (%p294_p3) target bundleno = 709 (0x2c5), region = 44 }
   0xe   : > { %s359_s9 = scalar_select %p358_p4, %s2921_s27, 7 }
   0xf   : > { %405 = sbr.rel (%p2296_p5) target bundleno = 22 (0x16), region = 48  ;;  %v2931_v0 = vmov (!%p2296_p5), 0.0  }
  0x10   : > { %s2637_s10 = smul.u32 48, %s359_s9  ;;  %s2482_s11 = sshll.u32 %s359_s9, 5  ;;  %406 = vst [vmem:[#allocation2] sm:$0xff] (!%p2296_p5), %v2931_v0  ;;  %407 = vst [vmem:[#allocation2 + $0x8] sm:$0xff] (!%p2296_p5), %v2931_v0 }
  0x11   : > { %s3000_s14 = scalar_lea.vmem %s3652_s6, %s2482_s11  ;;  %s3005_s17 = scalar_lea.vmem %s3653_s7, %s2482_s11  ;;  %408 = vst [vmem:[#allocation2 + $0x10] sm:$0xff] (!%p2296_p5), %v2931_v0  ;;  %409 = vst [vmem:[#allocation2 + $0x18] sm:$0xff] (!%p2296_p5), %v2931_v0 }
  0x12   : > { %s3010_s20 = scalar_lea.vmem %s3646_s0, %s2637_s10  ;;  %s3015_s23 = scalar_lea.vmem %s3654_s8, %s2482_s11 }
  0x16 PF: > { %v2665_v1 = vld [vmem:[%s3647_s1 + $0x4] ss:$12 sps:$4 sm:$0xff]   ;;  %v2667_v2 = vld [vmem:[%s3647_s1] ss:$12 sps:$4 sm:$0xff]   ;;  %v2932_v3 = vmov 0   ;;  %vm2933_vm2 = vmmov 1  }
  0x17   : > { %1072 = vmatprep.mubr.bf16.mxu1 %v2932_v3  ;;  %987 = vmatprep.subr.bf16.mxu0 %v2665_v1  ;;  %v2668_v4 = vld [vmem:[%s3647_s1 + $0x1c] ss:$12 sps:$4 sm:$0xff]   ;;  %v2670_v5 = vld [vmem:[%s3647_s1 + $0x18] ss:$12 sps:$4 sm:$0xff]   ;;  %v2671_v6 = vld [vmem:[%s3647_s1 + $0x34] ss:$12 sps:$4 sm:$0xff]  }
  0x18   : > { %988 = vmatpush1.bf16.msra.mxu0 %v2667_v2  ;;  %v2673_v7 = vld [vmem:[%s3647_s1 + $0x30] ss:$12 sps:$4 sm:$0xff]   ;;  %v2674_v8 = vld [vmem:[%s3647_s1 + $0x4c] ss:$12 sps:$4 sm:$0xff]   ;;  %v2676_v9 = vld [vmem:[%s3647_s1 + $0x48] ss:$12 sps:$4 sm:$0xff]  }
  0x19   : > { %989 = vmatprep.subr.bf16.mxu0 %v2668_v4  ;;  %v2677_v10 = vld [vmem:[%s3647_s1 + $0x64] ss:$12 sps:$4 sm:$0xff]   ;;  %v2694_v12 = vld [vmem:[%s3647_s1 + $0x180] ss:$12 sps:$4 sm:$0xff]   ;;  %v2697_v14 = vld [vmem:[%s3647_s1 + $0x19c] ss:$12 sps:$4 sm:$0xff]  }
  0x1a   : > { %v2691_v11 = vld [vmem:[%s3647_s1 + $0x184] ss:$12 sps:$4 sm:$0xff]   ;;  %v2679_v13 = vld [vmem:[%s3647_s1 + $0x60] ss:$12 sps:$4 sm:$0xff]   ;;  %v2680_v16 = vld [vmem:[%s3647_s1 + $0x7c] ss:$12 sps:$4 sm:$0xff]  }
  0x1b   : > { %1040 = vmatprep.subr.bf16.mxu1 %v2691_v11  ;;  %v2700_v15 = vld [vmem:[%s3647_s1 + $0x198] ss:$12 sps:$4 sm:$0xff]   ;;  %v2703_v17 = vld [vmem:[%s3647_s1 + $0x1b4] ss:$12 sps:$4 sm:$0xff]   ;;  %v2706_v19 = vld [vmem:[%s3647_s1 + $0x1b0] ss:$12 sps:$4 sm:$0xff]  }
  0x1c   : > { %990 = vmatpush1.bf16.msra.mxu0 %v2670_v5  ;;  %1041 = vmatpush1.bf16.msra.mxu1 %v2694_v12  ;;  %v2682_v18 = vld [vmem:[%s3647_s1 + $0x78] ss:$12 sps:$4 sm:$0xff]   ;;  %v2683_v20 = vld [vmem:[%s3647_s1 + $0x94] ss:$12 sps:$4 sm:$0xff]   ;;  %v2685_v22 = vld [vmem:[%s3647_s1 + $0x90] ss:$12 sps:$4 sm:$0xff]  }
  0x1d   : > { %991 = vmatprep.subr.bf16.mxu0 %v2671_v6  ;;  %1042 = vmatprep.subr.bf16.mxu1 %v2697_v14  ;;  %v2709_v21 = vld [vmem:[%s3647_s1 + $0x1cc] ss:$12 sps:$4 sm:$0xff]   ;;  %v2712_v24 = vld [vmem:[%s3647_s1 + $0x1c8] ss:$12 sps:$4 sm:$0xff]   ;;  %v2715_v25 = vld [vmem:[%s3647_s1 + $0x1e4] ss:$12 sps:$4 sm:$0xff]  }
  0x1e   : > { %v2686_v23 = vld [vmem:[%s3647_s1 + $0xac] ss:$12 sps:$4 sm:$0xff]   ;;  %v2688_v26 = vld [vmem:[%s3647_s1 + $0xa8] ss:$12 sps:$4 sm:$0xff]   ;;  %v2689_v28 = vld [vmem:[%s3647_s1 + $0xc4] ss:$12 sps:$4 sm:$0xff]  }
  0x1f   : > { %v2718_v27 = vld [vmem:[%s3647_s1 + $0x1e0] ss:$12 sps:$4 sm:$0xff]   ;;  %v2721_v29 = vld [vmem:[%s3647_s1 + $0x1fc] ss:$12 sps:$4 sm:$0xff]   ;;  %v2724_v32 = vld [vmem:[%s3647_s1 + $0x1f8] ss:$12 sps:$4 sm:$0xff]  }
  0x20   : > { %992 = vmatpush1.bf16.msra.mxu0 %v2673_v7  ;;  %1043 = vmatpush1.bf16.msra.mxu1 %v2700_v15  ;;  %v2693_v30 = vld [vmem:[%s3647_s1 + $0xc0] ss:$12 sps:$4 sm:$0xff]   ;;  %v2695_v31 = vld [vmem:[%s3647_s1 + $0xdc] ss:$12 sps:$4 sm:$0xff]   ;;  %v2739_v34 = vld [vmem:[%s3010_s20 + $0x4] ss:$12 sps:$4 sm:$0xff]  }
  0x21   : > { %993 = vmatprep.subr.bf16.mxu0 %v2674_v8  ;;  %1044 = vmatprep.subr.bf16.mxu1 %v2703_v17  ;;  %v2727_v33 = vld [vmem:[%s3647_s1 + $0x214] ss:$12 sps:$4 sm:$0xff]   ;;  %v2699_v35 = vld [vmem:[%s3647_s1 + $0xd8] ss:$12 sps:$4 sm:$0xff]   ;;  %v2730_v36 = vld [vmem:[%s3647_s1 + $0x210] ss:$12 sps:$4 sm:$0xff]  }
  0x22   : > { %v2701_v37 = vld [vmem:[%s3647_s1 + $0xf4] ss:$12 sps:$4 sm:$0xff]   ;;  %v2733_v38 = vld [vmem:[%s3647_s1 + $0x22c] ss:$12 sps:$4 sm:$0xff]   ;;  %1019 = vmatprep.mubr.bf16.mxu0 %v2739_v34  ;;  %v2705_v39 = vld [vmem:[%s3647_s1 + $0xf0] ss:$12 sps:$4 sm:$0xff]  }
  0x23   : > { %v2736_v40 = vld [vmem:[%s3647_s1 + $0x228] ss:$12 sps:$4 sm:$0xff]   ;;  %v2707_v41 = vld [vmem:[%s3647_s1 + $0x10c] ss:$12 sps:$4 sm:$0xff]   ;;  %v2713_v44 = vld [vmem:[%s3647_s1 + $0x124] ss:$12 sps:$4 sm:$0xff]  }
  0x24   : > { %994 = vmatpush1.bf16.msra.mxu0 %v2676_v9  ;;  %1045 = vmatpush1.bf16.msra.mxu1 %v2706_v19  ;;  %v3137_v42 = vld [vmem:[%s3010_s20 + $0x8] ss:$12 sps:$4 sm:$0xff]   ;;  %v2717_v45 = vld [vmem:[%s3647_s1 + $0x120] ss:$12 sps:$4 sm:$0xff]   ;;  %v2723_v47 = vld [vmem:[%s3647_s1 + $0x138] ss:$12 sps:$4 sm:$0xff]  }
  0x25   : > { %995 = vmatprep.subr.bf16.mxu0 %v2677_v10  ;;  %1046 = vmatprep.subr.bf16.mxu1 %v2709_v21  ;;  %v2711_v43 = vld [vmem:[%s3647_s1 + $0x108] ss:$12 sps:$4 sm:$0xff]   ;;  %v2729_v49 = vld [vmem:[%s3647_s1 + $0x150] ss:$12 sps:$4 sm:$0xff]   ;;  %v3163_v50 = vld [vmem:[%s3010_s20 + $0x20] ss:$12 sps:$4 sm:$0xff]  }
  0x26   : > { %v2719_v46 = vld [vmem:[%s3647_s1 + $0x13c] ss:$12 sps:$4 sm:$0xff]   ;;  %v2725_v48 = vld [vmem:[%s3647_s1 + $0x154] ss:$12 sps:$4 sm:$0xff]   ;;  %v2731_v51 = vld [vmem:[%s3647_s1 + $0x16c] ss:$12 sps:$4 sm:$0xff]  }
  0x27   : > { %v2735_v52 = vld [vmem:[%s3647_s1 + $0x168] ss:$12 sps:$4 sm:$0xff]   ;;  %v2743_v53 = vld [vmem:[%s3648_s2 + $0x4] ss:$8 sps:$4 sm:$0xff]   ;;  %v2744_v58 = vld [vmem:[%s3648_s2 + $0x10] ss:$8 sps:$4 sm:$0xff]  }
  0x28   : > { %996 = vmatpush1.bf16.msra.mxu0 %v2679_v13  ;;  %1047 = vmatpush1.bf16.msra.mxu1 %v2712_v24  ;;  %v3176_v54 = vld [vmem:[%s3010_s20] ss:$12 sps:$4 sm:$0xff]   ;;  %v3182_v56 = vld [vmem:[%s3010_s20 + $0x1c] ss:$12 sps:$4 sm:$0xff]   ;;  %v3199_v61 = vld [vmem:[%s3010_s20 + $0x18] ss:$12 sps:$4 sm:$0xff]  }
  0x29   : > { %997 = vmatprep.subr.bf16.mxu0 %v2680_v16  ;;  %1048 = vmatprep.subr.bf16.mxu1 %v2715_v25  ;;  %v2741_v55 = vld [vmem:[%s3648_s2] ss:$8 sps:$4 sm:$0xff]   ;;  %v2746_v57 = vld [vmem:[%s3648_s2 + $0x14] ss:$8 sps:$4 sm:$0xff]   ;;  %v2749_v59 = vld [vmem:[%s3648_s2 + $0x24] ss:$8 sps:$4 sm:$0xff]  }
  0x2a   : > { %v2747_v60 = vld [vmem:[%s3648_s2 + $0x20] ss:$8 sps:$4 sm:$0xff]   ;;  %v2752_v0 = vld [vmem:[%s3648_s2 + $0x34] ss:$8 sps:$4 sm:$0xff]   ;;  %v2750_v2 = vld [vmem:[%s3648_s2 + $0x30] ss:$8 sps:$4 sm:$0xff]  }
  0x2b   : > { %v3201_v62 = vld [vmem:[#allocation2] sm:$0xff]  ;;  %v3203_v63 = vld [vmem:[#allocation2 + $0x8] sm:$0xff]  ;;  %v2758_v6 = vld [vmem:[%s3648_s2 + $0x54] ss:$8 sps:$4 sm:$0xff]  }
  0x2c   : > { %998 = vmatpush1.bf16.msra.mxu0 %v2682_v18  ;;  %1049 = vmatpush1.bf16.msra.mxu1 %v2718_v27  ;;  %v1226_v1 = vpack.c.bf16 %v3203_v63, %v3201_v62  ;;  %v2755_v4 = vld [vmem:[%s3648_s2 + $0x44] ss:$8 sps:$4 sm:$0xff]   ;;  %v2753_v5 = vld [vmem:[%s3648_s2 + $0x40] ss:$8 sps:$4 sm:$0xff]   ;;  %v2756_v7 = vld [vmem:[%s3648_s2 + $0x50] ss:$8 sps:$4 sm:$0xff]  }
  0x2d   : > { %999 = vmatprep.subr.bf16.mxu0 %v2683_v20  ;;  %1050 = vmatprep.subr.bf16.mxu1 %v2721_v29  ;;  %v2761_v8 = vld [vmem:[%s3648_s2 + $0x64] ss:$8 sps:$4 sm:$0xff]   ;;  %v2759_v9 = vld [vmem:[%s3648_s2 + $0x60] ss:$8 sps:$4 sm:$0xff]   ;;  %v2764_v10 = vld [vmem:[%s3648_s2 + $0x74] ss:$8 sps:$4 sm:$0xff]  }
  0x2e   : > { %v2762_v11 = vld [vmem:[%s3648_s2 + $0x70] ss:$8 sps:$4 sm:$0xff]   ;;  %v2767_v12 = vld [vmem:[%s3648_s2 + $0x84] ss:$8 sps:$4 sm:$0xff]   ;;  %v2765_v13 = vld [vmem:[%s3648_s2 + $0x80] ss:$8 sps:$4 sm:$0xff]  }
  0x2f   : > { %v2770_v14 = vld [vmem:[%s3648_s2 + $0x94] ss:$8 sps:$4 sm:$0xff]   ;;  %v2768_v15 = vld [vmem:[%s3648_s2 + $0x90] ss:$8 sps:$4 sm:$0xff]   ;;  %v2773_v16 = vld [vmem:[%s3648_s2 + $0xa4] ss:$8 sps:$4 sm:$0xff]  }
  0x30   : > { %1000 = vmatpush1.bf16.msra.mxu0 %v2685_v22  ;;  %1051 = vmatpush1.bf16.msra.mxu1 %v2724_v32  ;;  %v2771_v17 = vld [vmem:[%s3648_s2 + $0xa0] ss:$8 sps:$4 sm:$0xff]   ;;  %v2776_v18 = vld [vmem:[%s3648_s2 + $0xb4] ss:$8 sps:$4 sm:$0xff]   ;;  %v2774_v19 = vld [vmem:[%s3648_s2 + $0xb0] ss:$8 sps:$4 sm:$0xff]  }
  0x31   : > { %1001 = vmatprep.subr.bf16.mxu0 %v2686_v23  ;;  %1052 = vmatprep.subr.bf16.mxu1 %v2727_v33  ;;  %v2779_v20 = vld [vmem:[%s3648_s2 + $0xc4] ss:$8 sps:$4 sm:$0xff]   ;;  %v2777_v21 = vld [vmem:[%s3648_s2 + $0xc0] ss:$8 sps:$4 sm:$0xff]   ;;  %v2782_v22 = vld [vmem:[%s3648_s2 + $0xd4] ss:$8 sps:$4 sm:$0xff]   ;;  %v414_v23 = vlaneseq }
  0x32   : > { %v2780_v24 = vld [vmem:[%s3648_s2 + $0xd0] ss:$8 sps:$4 sm:$0xff]   ;;  %v2789_v25 = vld [vmem:[%s3648_s2 + $0xe4] ss:$8 sps:$4 sm:$0xff]   ;;  %v1191_v29 = vrot.slane %v3201_v62, 7 }
  0x33   : > { %v3279_v27 = vshrl.u32 %v414_v23, 7  ;;  %v2792_v32 = vld [vmem:[%s3648_s2 + $0xf4] ss:$8 sps:$4 sm:$0xff]  }
  0x34   : > { %1002 = vmatpush1.bf16.msra.mxu0 %v2688_v26  ;;  %1053 = vmatpush1.bf16.msra.mxu1 %v2730_v36  ;;  %v3277_v26 = vld [vmem:[#allocation2 + $0x18] sm:$0xff] }
  0x35   : > { %1003 = vmatprep.subr.bf16.mxu0 %v2689_v28  ;;  %1054 = vmatprep.subr.bf16.mxu1 %v2733_v38  ;;  %v2787_v28 = vld [vmem:[%s3648_s2 + $0xe0] ss:$8 sps:$4 sm:$0xff]   ;;  %v423_v33 = vand.u32 15, %v3279_v27  ;;  %vm1195_vm0 = vcmp.lt.s32.totalorder %v3279_v27, 1  ;;  %v3302_v38 = vld [vmem:[#allocation2 + $0x10] sm:$0xff]  ;;  %vm1212_vm6 = vcmp.lt.s32.totalorder %v3279_v27, 7 }
  0x36   : > { %v1211_v23 = vrot.slane %v3277_v26, 1 }
  0x37   : > { %vm1200_vm1 = vcmp.ge.s32.totalorder %v423_v33, 1 }
  0x38   : > { %1004 = vmatpush1.bf16.msra.mxu0 %v2693_v30  ;;  %1055 = vmatpush1.bf16.msra.mxu1 %v2736_v40  ;;  %v1192_v30 = vrot.slane %v3203_v63, 7  ;;  %vm3309_vm3 = vmpackc.low %vm2933_vm2, %vm1200_vm1 }
  0x39   : > { %1005 = vmatprep.subr.bf16.mxu0 %v2695_v31  ;;  %v1194_v31 = vrot.slane %v3277_v26, 7 }
  0x3b   : > { %1073 = vmatmul.mubr.bf16.vlgmr.msra.gmra.mrb[0].mxu1 %v3137_v42  ;;  %v1199_v36 = vsel %vm1195_vm0, %v1194_v31, %v1191_v29 }
  0x3c   : > { %1006 = vmatpush1.bf16.msra.mxu0 %v2699_v35  ;;  %1082 = vmatprep.mubr.bf16.mxu1 %v2932_v3  ;;  %v1198_v35 = vsel %vm1195_vm0, %v1191_v29, %v1192_v30 }
  0x3d   : > { %1007 = vmatprep.subr.bf16.mxu0 %v2701_v37  ;;  %v2795_v37 = vld [vmem:[%s3648_s2 + $0x104] ss:$8 sps:$4 sm:$0xff]   ;;  %v2424_v40 = vpack.c.bf16 %v1198_v35, %v1199_v36 }
  0x3e   : > { %v2827_v35 = vld [vmem:[%s3647_s1 + $0x140] ss:$12 sps:$4 sm:$0xff]  }
  0x3f   : > { %v2828_v36 = vld [vmem:[%s3647_s1 + $0x80] ss:$12 sps:$4 sm:$0xff]  }
  0x40   : > { %1008 = vmatpush1.bf16.msra.mxu0 %v2705_v39  ;;  %v417_v39 = vadd.s32 16, %v3279_v27 }
  0x41   : > { %1009 = vmatprep.subr.bf16.mxu0 %v2707_v41  ;;  %v2793_v41 = vld [vmem:[%s3648_s2 + $0x100] ss:$8 sps:$4 sm:$0xff]  }
  0x43   : > { %1083 = vmatmul.mubr.bf16.gmra.mrb[4].mxu1 %v3163_v50 }
  0x44   : > { %1010 = vmatpush1.bf16.msra.mxu0 %v2711_v43  ;;  %1125 = vmatprep.mubr.bf16.mxu1 %v2739_v34  ;;  %v2790_v34 = vld [vmem:[%s3648_s2 + $0xf0] ss:$8 sps:$4 sm:$0xff]   ;;  %v2861_v43 = vld [vmem:[%s3649_s3 + $0xa0] sm:$0xff]  }
  0x45   : > { %1011 = vmatprep.subr.bf16.mxu0 %v2713_v44  ;;  %v1229_v44 = vpack.c.bf16 %v3277_v26, %v3302_v38 }
  0x48   : > { %1012 = vmatpush1.bf16.msra.mxu0 %v2717_v45  ;;  %v1193_v45 = vrot.slane %v3302_v38, 7 }
  0x49   : > { %1013 = vmatprep.subr.bf16.mxu0 %v2719_v46  ;;  %v2798_v46 = vld [vmem:[%s3648_s2 + $0x114] ss:$8 sps:$4 sm:$0xff]  }
  0x4c   : > { %1014 = vmatpush1.bf16.msra.mxu0 %v2723_v47  ;;  %v437_v47 = vand.u32 15, %v417_v39  ;;  %v2830_v39 = vld [vmem:[%s3647_s1 + $0x98] ss:$12 sps:$4 sm:$0xff]  }
  0x4d   : > { %1015 = vmatprep.subr.bf16.mxu0 %v2725_v48  ;;  %v2796_v48 = vld [vmem:[%s3648_s2 + $0x110] ss:$8 sps:$4 sm:$0xff]  }
  0x4e   : > { %vm1202_vm4 = vcmp.ge.s32.totalorder %v437_v47, 1  ;;  %v2836_v47 = vld [vmem:[%s3647_s1 + $0x1d0] ss:$12 sps:$4 sm:$0xff]  }
  0x4f   : > { %vm3335_vm5 = vmpackc.low %vm2933_vm2, %vm1202_vm4 }
  0x50   : > { %1016 = vmatpush1.bf16.msra.mxu0 %v2729_v49  ;;  %v1196_v49 = vsel %vm1195_vm0, %v1193_v45, %v1194_v31  ;;  %v2824_v31 = vld [vmem:[%s3647_s1 + $0x50] ss:$12 sps:$4 sm:$0xff]  }
  0x51   : > { %1017 = vmatprep.subr.bf16.mxu0 %v2731_v51  ;;  %v1197_v51 = vsel %vm1195_vm0, %v1192_v30, %v1193_v45  ;;  %v2834_v45 = vld [vmem:[%s3647_s1 + $0x1a0] ss:$12 sps:$4 sm:$0xff]  }
  0x54   : > { %1018 = vmatpush1.bf16.msra.mxu0 %v2735_v52  ;;  %v2801_v52 = vld [vmem:[%s3648_s2 + $0x124] ss:$8 sps:$4 sm:$0xff]  }
  0x55   : > { %1519 = vmatprep.subr.bf16.mxu0 %v2743_v53  ;;  %v2427_v53 = vpack.c.bf16 %v1196_v49, %v1197_v51  ;;  %v2841_v51 = vld [vmem:[%s3649_s3 + $0x40] sm:$0xff]  }
  0x57   : > { %1020 = vmatmul.mubr.bf16.vlgmr.msra.gmra.mrb[0].mxu0 %v3176_v54 }
  0x58   : > { %1520 = vmatpush1.bf16.msra.mxu0 %v2741_v55  ;;  %1029 = vmatprep.mubr.bf16.mxu0 %v3182_v56  ;;  %v2799_v55 = vld [vmem:[%s3648_s2 + $0x120] ss:$8 sps:$4 sm:$0xff]  }
  0x59   : > { %1521 = vmatprep.subr.bf16.mxu0 %v2746_v57  ;;  %v2863_v57 = vld [vmem:[%s3649_s3 + $0xb0] sm:$0xff]  }
  0x5c   : > { %1522 = vmatpush1.bf16.msra.mxu0 %v2744_v58  ;;  %v2804_v58 = vld [vmem:[%s3648_s2 + $0x134] ss:$8 sps:$4 sm:$0xff]  }
  0x5d   : > { %1523 = vmatprep.subr.bf16.mxu0 %v2749_v59  ;;  %v2802_v59 = vld [vmem:[%s3648_s2 + $0x130] ss:$8 sps:$4 sm:$0xff]  }
  0x5f   : > { %1030 = vmatmul.mubr.bf16.gmra.mrb[4].mxu0 %v3199_v61 }
  0x60   : > { %1524 = vmatpush1.bf16.msra.mxu0 %v2747_v60  ;;  %1551 = vmatprep.mubr.bf16.mxu0 %v1226_v1  ;;  %v2807_v60 = vld [vmem:[%s3648_s2 + $0x144] ss:$8 sps:$4 sm:$0xff]   ;;  %v2810_v1 = vld [vmem:[%s3648_s2 + $0x154] ss:$8 sps:$4 sm:$0xff]  }
  0x61   : > { %1525 = vmatprep.subr.bf16.mxu0 %v2752_v0  ;;  %v2805_v0 = vld [vmem:[%s3648_s2 + $0x140] ss:$8 sps:$4 sm:$0xff]  }
  0x64   : > { %1526 = vmatpush1.bf16.msra.mxu0 %v2750_v2  ;;  %v2808_v2 = vld [vmem:[%s3648_s2 + $0x150] ss:$8 sps:$4 sm:$0xff]  }
  0x65   : > { %1527 = vmatprep.subr.bf16.mxu0 %v2755_v4  ;;  %v2813_v4 = vld [vmem:[%s3648_s2 + $0x164] ss:$8 sps:$4 sm:$0xff]  }
  0x68   : > { %1528 = vmatpush1.bf16.msra.mxu0 %v2753_v5  ;;  %v416_v5 = vadd.s32 8, %v3279_v27 }
  0x69   : > { %1529 = vmatprep.subr.bf16.mxu0 %v2758_v6  ;;  %v1208_v6 = vrot.slane %v3201_v62, 1 }
  0x6b   : > { %v1216_v30 = vsel %vm1212_vm6, %v1211_v23, %v1208_v6 }
  0x6c   : > { %1530 = vmatpush1.bf16.msra.mxu0 %v2756_v7  ;;  %v1209_v7 = vrot.slane %v3203_v63, 1 }
  0x6d   : > { %1531 = vmatprep.subr.bf16.mxu0 %v2761_v8  ;;  %v1210_v8 = vrot.slane %v3302_v38, 1 }
  0x6f   : > { %v1213_v29 = vsel %vm1212_vm6, %v1210_v8, %v1211_v23 }
  0x70   : > { %1532 = vmatpush1.bf16.msra.mxu0 %v2759_v9  ;;  %v2811_v9 = vld [vmem:[%s3648_s2 + $0x160] ss:$8 sps:$4 sm:$0xff]   ;;  %v2433_v33 = vpack.c.bf16 %v1216_v30, %v1213_v29  ;;  %v2856_v30 = vld [vmem:[%s3649_s3 + $0x38] sm:$0xff]  }
  0x71   : > { %1533 = vmatprep.subr.bf16.mxu0 %v2764_v10  ;;  %v2816_v10 = vld [vmem:[%s3648_s2 + $0x174] ss:$8 sps:$4 sm:$0xff]  }
  0x74   : > { %1534 = vmatpush1.bf16.msra.mxu0 %v2762_v11  ;;  %v430_v11 = vand.u32 15, %v416_v5 }
  0x75   : > { %1535 = vmatprep.subr.bf16.mxu0 %v2767_v12  ;;  %v2817_v12 = vld [vmem:[%s3647_s1 + $0xc8] ss:$12 sps:$4 sm:$0xff]  }
  0x76   : > { %2485 = vmatprep.subr.bf16.mxu1 %v2817_v12  ;;  %vm1218_vm7 = vcmp.lt.s32.totalorder %v430_v11, 15  ;;  %v2851_v12 = vld [vmem:[%s3649_s3 + $0x68] sm:$0xff]  }
  0x77   : > { %vm3398_vm8 = vmpackc.low %vm1218_vm7, %vm2933_vm2 }
  0x78   : > { %1536 = vmatpush1.bf16.msra.mxu0 %v2765_v13  ;;  %v2818_v13 = vld [vmem:[%s3647_s1 + $0x8] ss:$12 sps:$4 sm:$0xff]  }
  0x79   : > { %1537 = vmatprep.subr.bf16.mxu0 %v2770_v14  ;;  %v2819_v14 = vld [vmem:[%s3647_s1 + $0xe0] ss:$12 sps:$4 sm:$0xff]   ;;  %2486 = vmatpush3.bf16.msra.mxu1 %v2818_v13 }
  0x7a   : > { %2487 = vmatprep.subr.bf16.mxu1 %v2819_v14 }
  0x7c   : > { %1538 = vmatpush1.bf16.msra.mxu0 %v2768_v15  ;;  %v2814_v15 = vld [vmem:[%s3648_s2 + $0x170] ss:$8 sps:$4 sm:$0xff]  }
  0x7d   : > { %1539 = vmatprep.subr.bf16.mxu0 %v2773_v16  ;;  %v1214_v16 = vsel %vm1212_vm6, %v1209_v7, %v1210_v8  ;;  %v2850_v8 = vld [vmem:[%s3649_s3 + $0x20] sm:$0xff]  }
  0x80   : > { %1540 = vmatpush1.bf16.msra.mxu0 %v2771_v17  ;;  %v1215_v17 = vsel %vm1212_vm6, %v1208_v6, %v1209_v7  ;;  %v2848_v6 = vld [vmem:[%s3649_s3 + $0x18] sm:$0xff]   ;;  %v2849_v7 = vld [vmem:[%s3649_s3 + $0x60] sm:$0xff]  }
  0x81   : > { %1541 = vmatprep.subr.bf16.mxu0 %v2776_v18  ;;  %v418_v18 = vadd.s32 24, %v3279_v27 }
  0x84   : > { %1542 = vmatpush1.bf16.msra.mxu0 %v2774_v19  ;;  %v2820_v19 = vld [vmem:[%s3647_s1 + $0x20] ss:$12 sps:$4 sm:$0xff]  }
  0x85   : > { %1543 = vmatprep.subr.bf16.mxu0 %v2779_v20  ;;  %v2821_v20 = vld [vmem:[%s3647_s1 + $0xf8] ss:$12 sps:$4 sm:$0xff]   ;;  %2488 = vmatpush3.bf16.msra.mxu1 %v2820_v19  ;;  %v2853_v19 = vld [vmem:[%s3649_s3 + $0x70] sm:$0xff]  }
  0x86   : > { %2489 = vmatprep.subr.bf16.mxu1 %v2821_v20  ;;  %v2854_v20 = vld [vmem:[%s3649_s3 + $0x30] sm:$0xff]  }
  0x88   : > { %1544 = vmatpush1.bf16.msra.mxu0 %v2777_v21  ;;  %v2430_v21 = vpack.c.bf16 %v1214_v16, %v1215_v17 }
  0x89   : > { %1545 = vmatprep.subr.bf16.mxu0 %v2782_v22  ;;  %v2864_v22 = vld [vmem:[%s3649_s3 + $0xb8] sm:$0xff]  }
  0x8c   : > { %1546 = vmatpush1.bf16.msra.mxu0 %v2780_v24  ;;  %v444_v24 = vand.u32 15, %v418_v18 }
  0x8d   : > { %1547 = vmatprep.subr.bf16.mxu0 %v2789_v25  ;;  %v2822_v25 = vld [vmem:[%s3647_s1 + $0x38] ss:$12 sps:$4 sm:$0xff]  }
  0x8e   : > { %vm1220_vm9 = vcmp.lt.s32.totalorder %v444_v24, 15  ;;  %2490 = vmatpush3.bf16.msra.mxu1 %v2822_v25  ;;  %v2855_v25 = vld [vmem:[%s3649_s3 + $0x78] sm:$0xff]  }
  0x8f   : > { %vm3423_vm10 = vmpackc.low %vm1220_vm9, %vm2933_vm2 }
  0x90   : > { %1548 = vmatpush1.bf16.msra.mxu0 %v2787_v28  ;;  %v2823_v28 = vld [vmem:[%s3647_s1 + $0x110] ss:$12 sps:$4 sm:$0xff]  }
  0x91   : > { %1549 = vmatprep.subr.bf16.mxu0 %v2792_v32  ;;  %2491 = vmatprep.subr.bf16.mxu1 %v2823_v28  ;;  %v2825_v32 = vld [vmem:[%s3647_s1 + $0x128] ss:$12 sps:$4 sm:$0xff]  }
  0x92   : > { %2492 = vmatpush3.bf16.msra.mxu1 %v2824_v31  ;;  %v3530_v31 = vld [vmem:[%s3649_s3 + $0x80] sm:$0xff]  }
  0x93   : > { %2493 = vmatprep.subr.bf16.mxu1 %v2825_v32 }
  0x94   : > { %1550 = vmatpush1.bf16.msra.mxu0 %v2790_v34  ;;  %v2826_v34 = vld [vmem:[%s3647_s1 + $0x68] ss:$12 sps:$4 sm:$0xff]  }
  0x95   : > { %1572 = vmatprep.subr.bf16.mxu0 %v2795_v37  ;;  %v2829_v37 = vld [vmem:[%s3647_s1 + $0x158] ss:$12 sps:$4 sm:$0xff]  }
  0x96   : > { %2494 = vmatpush3.bf16.msra.mxu1 %v2826_v34 }
  0x97   : > { %2425 = vmatmul.mubr.msk.bf16.vlgmr.msra.gmra.mrb[8].mxu0 %vm3309_vm3, %v2424_v40  ;;  %2495 = vmatprep.subr.bf16.mxu1 %v2827_v35  ;;  %v2831_v40 = vld [vmem:[%s3647_s1 + $0x170] ss:$12 sps:$4 sm:$0xff]   ;;  %v1637_v35 = vsub.s32 0, %v3279_v27 }
  0x98   : > { %1573 = vmatpush1.bf16.msra.mxu0 %v2793_v41  ;;  %1561 = vmatprep.mubr.bf16.mxu0 %v1229_v44  ;;  %v2832_v41 = vld [vmem:[%s3647_s1 + $0xb0] ss:$12 sps:$4 sm:$0xff]   ;;  %v2833_v44 = vld [vmem:[%s3647_s1 + $0x188] ss:$12 sps:$4 sm:$0xff]  }
  0x99   : > { %1574 = vmatprep.subr.bf16.mxu0 %v2798_v46  ;;  %v2835_v46 = vld [vmem:[%s3647_s1 + $0x1b8] ss:$12 sps:$4 sm:$0xff]  }
  0x9a   : > { %2496 = vmatpush3.bf16.msra.mxu1 %v2828_v36  ;;  %v1633_v36 = vld [vmem:[%s3650_s4] sm:$0x3] }
  0x9b   : > { %2497 = vmatprep.subr.bf16.mxu1 %v2829_v37  ;;  %v1641_v37 = vsub.s32 1, %v3279_v27  ;;  %v2859_v27 = vld [vmem:[%s3649_s3 + $0x90] sm:$0xff]  }
  0x9c   : > { %1575 = vmatpush1.bf16.msra.mxu0 %v2796_v48 }
  0x9d   : > { %1576 = vmatprep.subr.bf16.mxu0 %v2801_v52 }
  0x9e   : > { %2498 = vmatpush3.bf16.msra.mxu1 %v2830_v39  ;;  %v1638_v39 = vrot.slane %v1633_v36, %v1637_v35 }
  0x9f   : > { %2428 = vmatmul.mubr.msk.bf16.gmra.mrb[12].mxu0 %vm3335_vm5, %v2427_v53  ;;  %2499 = vmatprep.subr.bf16.mxu1 %v2831_v40  ;;  %v2842_v53 = vld [vmem:[%s3649_s3] sm:$0xff]  }
  0xa0   : > { %1577 = vmatpush1.bf16.msra.mxu0 %v2799_v55  ;;  %1604 = vmatprep.mubr.bf16.mxu0 %v2932_v3 }
  0xa1   : > { %1578 = vmatprep.subr.bf16.mxu0 %v2804_v58  ;;  %v2843_v58 = vld [vmem:[%s3649_s3 + $0x48] sm:$0xff]  }
  0xa2   : > { %2500 = vmatpush3.bf16.msra.mxu1 %v2832_v41  ;;  %v1642_v41 = vrot.slane %v1633_v36, %v1641_v37 }
  0xa3   : > { %2561 = vmatprep.subr.bf16.mxu1 %v2833_v44 }
  0xa4   : > { %1579 = vmatpush1.bf16.msra.mxu0 %v2802_v59  ;;  %v2844_v59 = vld [vmem:[%s3649_s3 + $0x8] sm:$0xff]  }
  0xa5   : > { %1580 = vmatprep.subr.bf16.mxu0 %v2807_v60  ;;  %1126 = vmatmul.mubr.bf16.vlgmr.msra.gmra.mrb[8].mxu1 %v3176_v54  ;;  %v2837_v54 = vld [vmem:[%s3647_s1 + $0x1e8] ss:$12 sps:$4 sm:$0xff]  }
  0xa6   : > { %2562 = vmatpush3.bf16.msra.mxu1 %v2833_v44  ;;  %1133 = vmatprep.mubr.bf16.mxu1 %v3182_v56  ;;  %v2838_v56 = vld [vmem:[%s3647_s1 + $0x200] ss:$12 sps:$4 sm:$0xff]   ;;  %v2845_v60 = vld [vmem:[%s3649_s3 + $0x50] sm:$0xff]  }
  0xa7   : > { %2563 = vmatprep.subr.bf16.mxu1 %v2834_v45 }
  0xa8   : > { %1581 = vmatpush1.bf16.msra.mxu0 %v2805_v0  ;;  %v2846_v0 = vld [vmem:[%s3649_s3 + $0x10] sm:$0xff]  }
  0xa9   : > { %1582 = vmatprep.subr.bf16.mxu0 %v2810_v1 }
  0xaa   : > { %2564 = vmatpush3.bf16.msra.mxu1 %v2834_v45 }
  0xab   : > { %2565 = vmatprep.subr.bf16.mxu1 %v2835_v46 }
  0xac   : > { %1583 = vmatpush1.bf16.msra.mxu0 %v2808_v2 }
  0xad   : > { %1584 = vmatprep.subr.bf16.mxu0 %v2813_v4  ;;  %1134 = vmatmul.mubr.bf16.gmra.mrb[12].mxu1 %v3199_v61  ;;  %v2839_v61 = vld [vmem:[%s3647_s1 + $0x218] ss:$12 sps:$4 sm:$0xff]  }
  0xae   : > { %2566 = vmatpush3.bf16.msra.mxu1 %v2835_v46  ;;  %2577 = vmatprep.mubr.bf16.mxu1 %v3137_v42  ;;  %v2840_v42 = vld [vmem:[%s3647_s1 + $0x230] ss:$12 sps:$4 sm:$0xff]  }
  0xaf   : > { %2567 = vmatprep.subr.bf16.mxu1 %v2836_v47  ;;  %v2847_v4 = vld [vmem:[%s3649_s3 + $0x58] sm:$0xff]  }
  0xb0   : > { %1585 = vmatpush1.bf16.msra.mxu0 %v2811_v9 }
  0xb1   : > { %1586 = vmatprep.subr.bf16.mxu0 %v2816_v10 }
  0xb2   : > { %2568 = vmatpush3.bf16.msra.mxu1 %v2836_v47 }
  0xb3   : > { %2569 = vmatprep.subr.bf16.mxu1 %v2837_v54 }
  0xb4   : > { %1587 = vmatpush1.bf16.msra.mxu0 %v2814_v15  ;;  %v2852_v15 = vld [vmem:[%s3649_s3 + $0x28] sm:$0xff]  }
  0xb6   : > { %2570 = vmatpush3.bf16.msra.mxu1 %v2837_v54 }
  0xb7   : > { %2431 = vmatmul.mubr.msk.bf16.vlgmr.msra.gmra.mrb[8].mxu0 %vm3398_vm8, %v2430_v21  ;;  %2571 = vmatprep.subr.bf16.mxu1 %v2838_v56 }
  0xb8   : > { %1614 = vmatprep.mubr.bf16.mxu0 %v2932_v3 }
  0xba   : > { %2572 = vmatpush3.bf16.msra.mxu1 %v2838_v56 }
  0xbb   : > { %2573 = vmatprep.subr.bf16.mxu1 %v2839_v61 }
  0xbe   : > { %2574 = vmatpush3.bf16.msra.mxu1 %v2839_v61 }
  0xbf   : > { %2434 = vmatmul.mubr.msk.bf16.gmra.mrb[12].mxu0 %vm3423_vm10, %v2433_v33  ;;  %2575 = vmatprep.subr.bf16.mxu1 %v2840_v42 }
  0xc2   : > { %2576 = vmatpush3.bf16.msra.mxu1 %v2840_v42 }
  0xc3   : > { %2523 = vmatprep.subr.bf16.mxu1 %v2841_v51 }
  0xc5   : > { %2578 = vmatmul.mubr.bf16.vlgmr.msra.gmra.mrb[16].mxu1 %v3163_v50 }
  0xc6   : > { %2524 = vmatpush3.bf16.msra.mxu1 %v2842_v53 }
  0xc7   : > { %2525 = vmatprep.subr.bf16.mxu1 %v2843_v58 }
  0xca   : > { %2526 = vmatpush3.bf16.msra.mxu1 %v2844_v59 }
  0xcb   : > { %2527 = vmatprep.subr.bf16.mxu1 %v2845_v60 }
  0xce   : > { %2528 = vmatpush3.bf16.msra.mxu1 %v2846_v0 }
  0xcf   : > { %2529 = vmatprep.subr.bf16.mxu1 %v2847_v4 }
  0xd2   : > { %2530 = vmatpush3.bf16.msra.mxu1 %v2848_v6 }
  0xd3   : > { %2531 = vmatprep.subr.bf16.mxu1 %v2849_v7 }
  0xd6   : > { %2532 = vmatpush3.bf16.msra.mxu1 %v2850_v8 }
  0xd7   : > { %2533 = vmatprep.subr.bf16.mxu1 %v2851_v12 }
  0xda   : > { %2534 = vmatpush3.bf16.msra.mxu1 %v2852_v15 }
  0xdb   : > { %2535 = vmatprep.subr.bf16.mxu1 %v2853_v19 }
  0xde   : > { %2536 = vmatpush3.bf16.msra.mxu1 %v2854_v20 }
  0xdf   : > { %2537 = vmatprep.subr.bf16.mxu1 %v2855_v25 }
  0xe2   : > { %2538 = vmatpush3.bf16.msra.mxu1 %v2856_v30 }
  0xe3   : > { %2581 = vmatprep.subr.bf16.mxu1 %v3530_v31 }
 0x10e   : > { %v1074_v48 = vpop.f32.mrb[0].mxu1 }
 0x10f   : > { %v1076_v49 = vpop.f32.mrb[1].mxu1 }
 0x110   : > { %v1078_v52 = vpop.f32.mrb[2].mxu1 }
 0x111   : > { %v1080_v55 = vpop.f32.mrb[3].mxu1 }
 0x116   : > { %v1084_v50 = vpop.f32.mrb[4].mxu1 }
 0x117   : > { %v1086_v1 = vpop.f32.mrb[5].mxu1 }
 0x118   : > { %v1088_v2 = vpop.f32.mrb[6].mxu1 }
 0x119   : > { %v1090_v5 = vpop.f32.mrb[7].mxu1 }
 0x12a   : > { %v1021_v9 = vpop.f32.mrb[0].mxu0 }
 0x12b   : > { %v1075_v10 = vadd.f32 %v1074_v48, %v1021_v9  ;;  %v1023_v11 = vpop.f32.mrb[1].mxu0 }
 0x12c   : > { %v1077_v13 = vadd.f32 %v1076_v49, %v1023_v11  ;;  %v1025_v14 = vpop.f32.mrb[2].mxu0 }
 0x12d   : > { %v1079_v16 = vadd.f32 %v1078_v52, %v1025_v14  ;;  %v1027_v17 = vpop.f32.mrb[3].mxu0 }
 0x12e   : > { %v1081_v18 = vadd.f32 %v1080_v55, %v1027_v17 }
 0x132   : > { %v1031_v21 = vpop.f32.mrb[4].mxu0 }
 0x133   : > { %v1085_v23 = vadd.f32 %v1084_v50, %v1031_v21  ;;  %v1033_v24 = vpop.f32.mrb[5].mxu0 }
 0x134   : > { %v1087_v28 = vadd.f32 %v1086_v1, %v1033_v24  ;;  %v1035_v29 = vpop.f32.mrb[6].mxu0 }
 0x135   : > { %v1089_v32 = vadd.f32 %v1088_v2, %v1035_v29  ;;  %v1037_v33 = vpop.f32.mrb[7].mxu0 }
 0x136   : > { %v1091_v34 = vadd.f32 %v1090_v5, %v1037_v33 }
 0x178   : > { %v2501_v24 = vpop.f32.mrb[8].mxu1 }
 0x179   : > { %v2502_v29 = vpop.f32.mrb[9].mxu1 }
 0x17a   : > { %v3538_v33 = vadd.f32 %v2502_v29, %v2501_v24 }
 0x18a   : > { %v1606_v40 = vpop.f32.mrb[8].mxu0 }
 0x18b   : > { %v2602_v44 = vadd.f32 %v1606_v40, %v1075_v10  ;;  %v1608_v45 = vpop.f32.mrb[9].mxu0 }
 0x18c   : > { %v2604_v46 = vadd.f32 %v1608_v45, %v1077_v13  ;;  %v1610_v47 = vpop.f32.mrb[10].mxu0 }
 0x18d   : > { %v1645_v54 = vadd.f32 %v2602_v44, %v1638_v39  ;;  %v2606_v56 = vadd.f32 %v1610_v47, %v1079_v16  ;;  %v1612_v61 = vpop.f32.mrb[11].mxu0 }
 0x18e   : > { %v1646_v42 = vadd.f32 %v2604_v46, %v1642_v41  ;;  %v2608_v48 = vadd.f32 %v1612_v61, %v1081_v18 }
 0x18f   : > { %v2435_v49 = vmul.f32 -1.442695, %v1645_v54  ;;  %v1647_v51 = vadd.f32 %v2606_v56, %v1638_v39 }
 0x190   : > { %v2439_v52 = vmul.f32 -1.442695, %v1646_v42  ;;  %v1648_v53 = vadd.f32 %v2608_v48, %v1642_v41 }
 0x191   : > { %2865 = vpow2.f32 %v2435_v49  ;;  %v2436_v55 = vmul.f32 -1.442695, %v1647_v51 }
 0x192   : > { %2867 = vpow2.f32 %v2439_v52  ;;  %v2440_v58 = vmul.f32 -1.442695, %v1648_v53  ;;  %v1616_v59 = vpop.f32.mrb[12].mxu0 }
 0x193   : > { %2869 = vpow2.f32 %v2436_v55  ;;  %v2610_v60 = vadd.f32 %v1616_v59, %v1085_v23  ;;  %v1618_v0 = vpop.f32.mrb[13].mxu0 }
 0x194   : > { %2871 = vpow2.f32 %v2440_v58  ;;  %v2612_v50 = vadd.f32 %v1618_v0, %v1087_v28  ;;  %v1620_v1 = vpop.f32.mrb[14].mxu0 }
 0x195   : > { %v1649_v2 = vadd.f32 %v2610_v60, %v1638_v39  ;;  %v2614_v4 = vadd.f32 %v1620_v1, %v1089_v32  ;;  %v1622_v5 = vpop.f32.mrb[15].mxu0 }
 0x196   : > { %v1650_v6 = vadd.f32 %v2612_v50, %v1642_v41  ;;  %v2616_v7 = vadd.f32 %v1622_v5, %v1091_v34  ;;  %v2504_v34 = vpop.f32.mrb[10].mxu1 }
 0x197   : > { %v2437_v8 = vmul.f32 -1.442695, %v1649_v2  ;;  %v1651_v9 = vadd.f32 %v2614_v4, %v1638_v39  ;;  %v2505_v37 = vpop.f32.mrb[11].mxu1 }
 0x198   : > { %v2441_v10 = vmul.f32 -1.442695, %v1650_v6  ;;  %v1652_v11 = vadd.f32 %v2616_v7, %v1642_v41  ;;  %v3540_v40 = vadd.f32 %v2505_v37, %v2504_v34  ;;  %v2507_v56 = vpop.f32.mrb[12].mxu1 }
 0x199   : > { %2873 = vpow2.f32 %v2437_v8  ;;  %v2438_v12 = vmul.f32 -1.442695, %v1651_v9  ;;  %v2508_v48 = vpop.f32.mrb[13].mxu1 }
 0x19a   : > { %2875 = vpow2.f32 %v2441_v10  ;;  %v2442_v13 = vmul.f32 -1.442695, %v1652_v11  ;;  %v2510_v53 = vpop.f32.mrb[14].mxu1 }
 0x19b   : > { %v2866_v14 = vpop.eup %2865  ;;  %2877 = vpow2.f32 %v2438_v12  ;;  %v2511_v55 = vpop.f32.mrb[15].mxu1 }
 0x19c   : > { %v2868_v15 = vpop.eup %2867  ;;  %v1665_v16 = vadd.f32 1.0, %v2866_v14  ;;  %2879 = vpow2.f32 %v2442_v13  ;;  %v3560_v59 = vadd.f32 %v2511_v55, %v2510_v53 }
 0x19d   : > { %v2870_v17 = vpop.eup %2869  ;;  %v1689_v18 = vadd.f32 1.0, %v2868_v15 }
 0x19e   : > { %v2872_v19 = vpop.eup %2871  ;;  %2881 = vrcp.f32 %v1665_v16  ;;  %v1666_v20 = vadd.f32 1.0, %v2870_v17  ;;  %v2858_v17 = vld [vmem:[%s3649_s3 + $0x88] sm:$0xff]  }
 0x19f   : > { %2883 = vrcp.f32 %v1689_v18  ;;  %v1690_v21 = vadd.f32 1.0, %v2872_v19 }
 0x1a0   : > { %2885 = vrcp.f32 %v1666_v20 }
 0x1a1   : > { %2887 = vrcp.f32 %v1690_v21  ;;  %v2860_v21 = vld [vmem:[%s3649_s3 + $0x98] sm:$0xff]  }
 0x1a3   : > { %v2874_v23 = vpop.eup %2873 }
 0x1a4   : > { %v2876_v25 = vpop.eup %2875  ;;  %v1667_v28 = vadd.f32 1.0, %v2874_v23 }
 0x1a5   : > { %v2878_v30 = vpop.eup %2877  ;;  %v1691_v32 = vadd.f32 1.0, %v2876_v25 }
 0x1a6   : > { %v2880_v35 = vpop.eup %2879  ;;  %2889 = vrcp.f32 %v1667_v28  ;;  %v1668_v36 = vadd.f32 1.0, %v2878_v30 }
 0x1a7   : > { %2891 = vrcp.f32 %v1691_v32  ;;  %v1692_v39 = vadd.f32 1.0, %v2880_v35 }
 0x1a8   : > { %v2882_v41 = vpop.eup %2881  ;;  %2893 = vrcp.f32 %v1668_v36 }
 0x1a9   : > { %v3542_v44 = vpop.eup %2883  ;;  %2068 = vst [vmem:[%s3005_s17] sm:$0xff] %v2882_v41  ;;  %2895 = vrcp.f32 %v1692_v39  ;;  %v1701_v45 = vmul.f32 %v2882_v41, %v3201_v62  ;;  %v3554_v62 = vadd.f32 %v2508_v48, %v2507_v56  ;;  %v2479_v56 = vld [vmem:[%s3651_s5] ss:$0 sm:$0xff] }
 0x1aa   : > { %v2886_v46 = vpop.eup %2885  ;;  %2072 = vst [vmem:[%s3015_s23] sm:$0xff] %v3542_v44 }
 0x1ab   : > { %v3548_v47 = vpop.eup %2887  ;;  %2069 = vst [vmem:[%s3005_s17 + $0x8] sm:$0xff] %v2886_v46  ;;  %v1702_v54 = vmul.f32 %v2886_v46, %v3203_v63  ;;  %v1705_v61 = vrot.slane %v1701_v45, 7  ;;  %v1717_v42 = vrot.slane %v1701_v45, 1 }
 0x1ac   : > { %2073 = vst [vmem:[%s3015_s23 + $0x8] sm:$0xff] %v3548_v47 }
 0x1ad   : > { %v1706_v49 = vrot.slane %v1702_v54, 7  ;;  %v1730_v51 = vpack.c.bf16 %v1702_v54, %v1701_v45  ;;  %v1718_v52 = vrot.slane %v1702_v54, 1 }
 0x1af   : > { %1959 = vmatprep.mubr.bf16.mxu1 %v1730_v51  ;;  %v1711_v63 = vsel %vm1195_vm0, %v1705_v61, %v1706_v49  ;;  %v1723_v58 = vsel %vm1212_vm6, %v1717_v42, %v1718_v52 }
 0x1b0   : > { %v2890_v60 = vpop.eup %2889 }
 0x1b1   : > { %v3562_v0 = vpop.eup %2891  ;;  %2070 = vst [vmem:[%s3005_s17 + $0x10] sm:$0xff] %v2890_v60  ;;  %v1703_v50 = vmul.f32 %v2890_v60, %v3302_v38 }
 0x1b2   : > { %v2894_v1 = vpop.eup %2893  ;;  %2074 = vst [vmem:[%s3015_s23 + $0x10] sm:$0xff] %v3562_v0 }
 0x1b3   : > { %v3568_v2 = vpop.eup %2895  ;;  %v1704_v4 = vmul.f32 %v2894_v1, %v3277_v26  ;;  %2071 = vst [vmem:[%s3005_s17 + $0x18] sm:$0xff] %v2894_v1  ;;  %v1707_v5 = vrot.slane %v1703_v50, 7  ;;  %v1719_v6 = vrot.slane %v1703_v50, 1 }
 0x1b4   : > { %2075 = vst [vmem:[%s3015_s23 + $0x18] sm:$0xff] %v3568_v2 }
 0x1b5   : > { %v1708_v7 = vrot.slane %v1704_v4, 7  ;;  %v1733_v8 = vpack.c.bf16 %v1704_v4, %v1703_v50  ;;  %v1710_v9 = vsel %vm1195_vm0, %v1706_v49, %v1707_v5  ;;  %v1720_v10 = vrot.slane %v1704_v4, 1 }
 0x1b6   : > { %v1722_v11 = vsel %vm1212_vm6, %v1718_v52, %v1719_v6  ;;  %v2045_v50 = vsub.f32 1.0, %v3548_v47 }
 0x1b7   : > { %v1712_v12 = vsel %vm1195_vm0, %v1708_v7, %v1705_v61  ;;  %v1709_v13 = vsel %vm1195_vm0, %v1707_v5, %v1708_v7  ;;  %v1721_v14 = vsel %vm1212_vm6, %v1719_v6, %v1720_v10  ;;  %v1724_v15 = vsel %vm1212_vm6, %v1720_v10, %v1717_v42  ;;  %v2905_v7 = vld [vmem:[#allocation2] sm:$0xff] }
 0x1b8   : > { %v2468_v16 = vpack.c.bf16 %v1711_v63, %v1712_v12  ;;  %v2471_v18 = vpack.c.bf16 %v1709_v13, %v1710_v9  ;;  %v2474_v19 = vpack.c.bf16 %v1722_v11, %v1723_v58  ;;  %v2477_v20 = vpack.c.bf16 %v1724_v15, %v1721_v14  ;;  %v2906_v15 = vld [vmem:[#allocation2 + $0x8] sm:$0xff] }
 0x1b9   : > { %v2046_v63 = vsub.f32 1.0, %v3562_v0  ;;  %v2044_v58 = vsub.f32 1.0, %v3542_v44 }
 0x1ba   : > { %2469 = vmatmul.mubr.msk.bf16.vlgmr.msra.gmra.mrb[20].mxu1 %vm3309_vm3, %v2468_v16  ;;  %v2049_v16 = vmul.f32 %v2906_v15, %v2045_v50 }
 0x1bb   : > { %2582 = vmatpush3.bf16.msra.mxu1 %v3530_v31  ;;  %1967 = vmatprep.mubr.bf16.mxu1 %v1733_v8  ;;  %v2862_v31 = vld [vmem:[%s3649_s3 + $0xa8] sm:$0xff]   ;;  %v2050_v4 = vmul.f32 %v2046_v63, %v3302_v38  ;;  %v2048_v8 = vmul.f32 %v2905_v7, %v2044_v58 }
 0x1bc   : > { %2583 = vmatprep.subr.bf16.mxu1 %v2858_v17 }
 0x1bf   : > { %2584 = vmatpush3.bf16.msra.mxu1 %v2858_v17 }
 0x1c0   : > { %2585 = vmatprep.subr.bf16.mxu1 %v2859_v27 }
 0x1c2   : > { %2472 = vmatmul.mubr.msk.bf16.gmra.mrb[24].mxu1 %vm3335_vm5, %v2471_v18 }
 0x1c3   : > { %2586 = vmatpush3.bf16.msra.mxu1 %v2859_v27  ;;  %2597 = vmatprep.mubr.msk.bf16.mxu1 %vm3398_vm8, %v2474_v19 }
 0x1c4   : > { %2587 = vmatprep.subr.bf16.mxu1 %v2860_v21 }
 0x1c7   : > { %2588 = vmatpush3.bf16.msra.mxu1 %v2860_v21 }
 0x1c8   : > { %2589 = vmatprep.subr.bf16.mxu1 %v2861_v43 }
 0x1cb   : > { %2590 = vmatpush3.bf16.msra.mxu1 %v2861_v43 }
 0x1cc   : > { %2591 = vmatprep.subr.bf16.mxu1 %v2862_v31 }
 0x1cf   : > { %2592 = vmatpush3.bf16.msra.mxu1 %v2862_v31 }
 0x1d0   : > { %2593 = vmatprep.subr.bf16.mxu1 %v2863_v57 }
 0x1d3   : > { %2594 = vmatpush3.bf16.msra.mxu1 %v2863_v57 }
 0x1d4   : > { %2595 = vmatprep.subr.bf16.mxu1 %v2864_v22 }
 0x1d7   : > { %2596 = vmatpush3.bf16.msra.mxu1 %v2864_v22 }
 0x1da   : > { %2598 = vmatmul.mubr.msk.bf16.vlgmr.msra.gmra.mrb[16].mxu1 %vm3423_vm10, %v2477_v20 }
 0x28d   : > { %v2539_v23 = vpop.f32.mrb[20].mxu1 }
 0x28e   : > { %v2540_v24 = vpop.f32.mrb[21].mxu1 }
 0x28f   : > { %v2541_v25 = vadd.f32 %v2540_v24, %v2539_v23  ;;  %v2542_v28 = vpop.f32.mrb[22].mxu1 }
 0x290   : > { %v2543_v29 = vpop.f32.mrb[23].mxu1 }
 0x291   : > { %v2544_v30 = vadd.f32 %v2543_v29, %v2542_v28  ;;  %v2619_v32 = vadd.f32 %v2541_v25, %v3538_v33 }
 0x293   : > { %v2623_v34 = vadd.f32 %v2544_v30, %v3540_v40 }
 0x295   : > { %v2545_v35 = vpop.f32.mrb[24].mxu1 }
 0x296   : > { %v2546_v36 = vpop.f32.mrb[25].mxu1 }
 0x297   : > { %v2547_v37 = vadd.f32 %v2546_v36, %v2545_v35  ;;  %v2548_v39 = vpop.f32.mrb[26].mxu1 }
 0x298   : > { %v2549_v41 = vpop.f32.mrb[27].mxu1 }
 0x299   : > { %v2550_v45 = vadd.f32 %v2549_v41, %v2548_v39  ;;  %v2617_v46 = vadd.f32 %v2547_v37, %v3554_v62 }
 0x29b   : > { %v2621_v3 = vadd.f32 %v2550_v45, %v3560_v59  ;;  %v2047_v59 = vsub.f32 1.0, %v3568_v2 }
 0x29d   : > { %v2051_v12 = vmul.f32 %v2047_v59, %v3277_v26 }
 0x2ad   : > { %v2599_v54 = vpop.f32.mrb[16].mxu1 }
 0x2ae   : > { %v2618_v61 = vadd.f32 %v2617_v46, %v2599_v54  ;;  %v2010_v42 = vpop.f32.mrb[17].mxu1 }
 0x2af   : > { %v2620_v33 = vadd.f32 %v2619_v32, %v2010_v42  ;;  %v2600_v48 = vpop.f32.mrb[18].mxu1 }
 0x2b0   : > { %v2038_v40 = vadd.f32 %v2618_v61, %v2479_v56  ;;  %v2622_v49 = vadd.f32 %v2621_v3, %v2600_v48  ;;  %v2013_v51 = vpop.f32.mrb[19].mxu1 }
 0x2b1   : > { %v2036_v52 = vadd.f32 %v2620_v33, %v2479_v56  ;;  %v2624_v53 = vadd.f32 %v2623_v34, %v2013_v51 }
 0x2b2   : > { %2897 = vtanh.f32 %v2038_v40  ;;  %v2039_v55 = vadd.f32 %v2622_v49, %v2479_v56 }
 0x2b3   : > { %2899 = vtanh.f32 %v2036_v52  ;;  %v2037_v62 = vadd.f32 %v2624_v53, %v2479_v56 }
 0x2b4   : > { %2901 = vtanh.f32 %v2039_v55 }
 0x2b5   : > { %2903 = vtanh.f32 %v2037_v62 }
 0x2bc   : > { %v2898_v60 = vpop.eup %2897 }
 0x2bd   : > { %v2900_v1 = vpop.eup %2899  ;;  %v2054_v5 = vmul.f32 %v2898_v60, %v3562_v0 }
 0x2be   : > { %v2902_v6 = vpop.eup %2901  ;;  %v2052_v9 = vmul.f32 %v2900_v1, %v3542_v44 }
 0x2bf   : > { %v2904_v10 = vpop.eup %2903  ;;  %v2058_v11 = vadd.f32 %v2054_v5, %v2050_v4  ;;  %v2055_v13 = vmul.f32 %v2902_v6, %v3568_v2 }
 0x2c0   : > { %v2056_v14 = vadd.f32 %v2052_v9, %v2048_v8  ;;  %v2053_v38 = vmul.f32 %v2904_v10, %v3548_v47 }
 0x2c1   : > { %2062 = vst [vmem:[#allocation2 + $0x10] sm:$0xff] %v2058_v11  ;;  %2066 = vst [vmem:[%s3000_s14 + $0x10] sm:$0xff] %v2058_v11  ;;  %v2059_v0 = vadd.f32 %v2055_v13, %v2051_v12 }
 0x2c2   : > { %2060 = vst [vmem:[#allocation2] sm:$0xff] %v2056_v14  ;;  %2064 = vst [vmem:[%s3000_s14] sm:$0xff] %v2056_v14  ;;  %v2057_v17 = vadd.f32 %v2053_v38, %v2049_v16 }
 0x2c3   : > { %2063 = vst [vmem:[#allocation2 + $0x18] sm:$0xff] %v2059_v0  ;;  %2067 = vst [vmem:[%s3000_s14 + $0x18] sm:$0xff] %v2059_v0 }
 0x2c4   : > { %2061 = vst [vmem:[#allocation2 + $0x8] sm:$0xff] %v2057_v17  ;;  %2065 = vst [vmem:[%s3000_s14 + $0x8] sm:$0xff] %v2057_v17 }
 0x2c5 PF: > { %s19_s29 = sadd.s32 1, %s2929_s29   ;;  %s3663_s27 = smov %s2925_s28 }
 0x2c6   : > { %p16_p6 = scmp.ge.s32.totalorder %s19_s29, 10   ;;  %s3664_s28 = smov %s3666_s30 }
 0x2c8   :  { %18 = sbr.rel (!%p16_p6) target bundleno = 2 (0x2), region = 102 }

</bundles_post_ra>
